<compile_context>
chip_gen: v7x
topology: tpu7x:2x2x1
jax: 0.10.0
libtpu: 0.0.40
codegen_flags: <defaults>
</compile_context>

<pallas_src>
import jax
import jax.numpy as jnp
from jax.experimental import pallas as pl
from jax.experimental.pallas import tpu as pltpu

# Hyper-parameters consistent with EncoderLayer(d_model, d_k, d_v, h, d_ff)
D_MODEL = 32
D_K = 8
D_V = 8
N_HEADS = 4
D_FF = 64
LN_EPS = 1e-5          # nn.LayerNorm default
NEG_BIG = -1e30        # finite "minus infinity" for additive attention masking

# ---------------- packed-parameter slab layout (one (240, 128) bf16 input) --
SLAB_COLS = 128
ROW_WQKV = 0                          # (D_MODEL, 3*H*D_K) in cols 0:96,  rows   0..31
ROW_WO = ROW_WQKV + D_MODEL           # (H*D_V, D_MODEL)   in cols 0:32,  rows  32..63
ROW_W1 = ROW_WO + N_HEADS * D_V       # (D_MODEL, D_FF)    in cols 0:64,  rows  64..95
ROW_W2 = ROW_W1 + D_MODEL             # (D_FF, D_MODEL) padded to 128 rows, rows 96..223
ROW_VEC = ROW_W2 + SLAB_COLS          # 10 rows of (1, <=128) vectors,     rows 224..233
(V_BQKV, V_BO, V_G1, V_BE1, V_G2, V_BE2, V_B1, V_B2, V_G3, V_BE3) = range(10)
N_SLAB_ROWS = ROW_VEC + 16            # padded to a multiple of 8 sublanes (240)


def _layer_norm(z, g, b):
    mu = jnp.mean(z, axis=-1, keepdims=True)
    var = jnp.mean((z - mu) ** 2, axis=-1, keepdims=True)
    return (z - mu) * jax.lax.rsqrt(var + LN_EPS) * g + b


# ------------------------------- kernel -------------------------------------
def _encoder_layer_kernel(x_ref, mask_ref, p_ref, out_ref):
    BB, S, D = x_ref.shape
    HDK = N_HEADS * D_K
    HDV = N_HEADS * D_V
    rows = BB * S
    f32 = jnp.float32

    # bf16 in HBM/VMEM, bf16 MXU operands with f32 accumulation; all
    # element-wise / LayerNorm / softmax math in f32.
    x_bf = x_ref[...].reshape(rows, D)                 # (rows, D) bf16 (leading-dim reshape)
    xf = x_bf.astype(f32)                              # f32 residual copy

    mm = mask_ref[...]                                 # (BB, S, 2) f32
    pmask = mm[:, :, 0:1].reshape(rows, 1)             # (rows, 1) multiplicative pad mask
    kbias = mm[:, :, 1:2] * f32(NEG_BIG)               # (BB, S, 1) additive per-key bias
    ones = jnp.ones((BB, S, 1), f32)                   # hoisted out of the head loop

    # weight panels, full 128 lanes wide (zero padded) -> no masked sub-lane loads
    wqkv = p_ref[ROW_WQKV:ROW_WQKV + D, :]             # (D, 128)    bf16
    wo = p_ref[ROW_WO:ROW_WO + HDV, :]                 # (HDV, 128)  bf16
    w1 = p_ref[ROW_W1:ROW_W1 + D, :]                   # (D, 128)    bf16
    w2 = p_ref[ROW_W2:ROW_W2 + SLAB_COLS, :]           # (128, 128)  bf16 (rows >= D_FF are 0)

    def vec(idx):
        return p_ref[ROW_VEC + idx:ROW_VEC + idx + 1, :].astype(f32)   # (1, 128)

    bqkv = vec(V_BQKV)
    bo, b1, b2 = vec(V_BO), vec(V_B1), vec(V_B2)
    g1, be1 = vec(V_G1)[:, :D], vec(V_BE1)[:, :D]
    g2, be2 = vec(V_G2)[:, :D], vec(V_BE2)[:, :D]
    g3, be3 = vec(V_G3)[:, :D], vec(V_BE3)[:, :D]

    # ---- fused QKV projection (1/sqrt(d_k) already folded into Wq / bq) ----
    qkv = jnp.dot(x_bf, wqkv, preferred_element_type=f32) + bqkv        # (rows, 128)
    qkv3 = qkv.reshape(BB, S, SLAB_COLS)                                # (BB, S, 128)

    # ---- per-head attention, fully register resident ------------------------
    head_outs = []
    for h in range(N_HEADS):
        qh = qkv3[:, :, h * D_K:(h + 1) * D_K]                          # (BB, S, Dk)
        kh = qkv3[:, :, HDK + h * D_K:HDK + (h + 1) * D_K]              # (BB, S, Dk)
        vh = qkv3[:, :, 2 * HDK + h * D_V:2 * HDK + (h + 1) * D_V]      # (BB, S, Dv)
        # key-padding mask folded into the score matmul:
        #   [q, 1] . [k, bias_k]^T  =  q.k + bias_k   (no (BB,1,S) relayout needed)
        qa = jnp.concatenate([qh, ones], axis=-1)                       # (BB, S, Dk+1)
        ka = jnp.concatenate([kh, kbias], axis=-1)                      # (BB, S, Dk+1)
        s = jnp.einsum('bqd,bkd->bqk', qa, ka, preferred_element_type=f32)
        s = jnp.exp(s - jnp.max(s, axis=-1, keepdims=True))             # overwrite in place
        att = s * pl.reciprocal(jnp.sum(s, axis=-1, keepdims=True), approx=True)
        head_outs.append(jnp.einsum('bqk,bkd->bqd', att, vh,
                                    preferred_element_type=f32))
    ocat = jnp.concatenate(head_outs, axis=-1).reshape(rows, HDV)       # (rows, H*Dv)

    # ---- output projection + MHA residual/LN + lnorm1 ------------------------
    o = (jnp.dot(ocat.astype(jnp.bfloat16), wo,
                 preferred_element_type=f32) + bo)[:, :D]               # (rows, D)
    att_out = _layer_norm(xf + o, g1, be1)            # MHA internal layer_norm
    sa = _layer_norm(xf + att_out, g2, be2)           # lnorm1(input + dropout1(self_att))
    sa = sa * pmask                                   # self_att * mask_pad

    # ---- position-wise feed-forward ------------------------------------------
    h1 = jnp.maximum(jnp.dot(sa.astype(jnp.bfloat16), w1,
                             preferred_element_type=f32) + b1, 0.0)     # (rows, 128)
    h2 = (jnp.dot(h1.astype(jnp.bfloat16), w2,
                  preferred_element_type=f32) + b2)[:, :D]              # (rows, D)
    ff = _layer_norm(sa + h2, g3, be3)                # pwff internal layer_norm
    ff = ff * pmask                                   # ff * mask_pad

    out_ref[...] = ff.reshape(BB, S, D).astype(out_ref.dtype)


# ------------------------- parameter packing --------------------------------
def _pack_params(p):
    """Pack all weights / biases / LayerNorm params into one (240, 128) bf16 slab."""
    slab = jnp.zeros((N_SLAB_ROWS, SLAB_COLS), jnp.float32)

    def put(s, row, arr):
        arr = jnp.asarray(arr, jnp.float32)
        return s.at[row:row + arr.shape[0], 0:arr.shape[1]].set(arr)

    scale = 1.0 / (D_K ** 0.5)   # fold attention score scale into Wq / bq
    wqkv = jnp.concatenate([jnp.asarray(p["wq"], jnp.float32) * scale,
                            jnp.asarray(p["wk"], jnp.float32),
                            jnp.asarray(p["wv"], jnp.float32)], axis=1)
    bqkv = jnp.concatenate([jnp.asarray(p["bq"], jnp.float32) * scale,
                            jnp.asarray(p["bk"], jnp.float32),
                            jnp.asarray(p["bv"], jnp.float32)], axis=1)
    slab = put(slab, ROW_WQKV, wqkv)
    slab = put(slab, ROW_WO, p["wo"])
    slab = put(slab, ROW_W1, p["w1"])
    slab = put(slab, ROW_W2, p["w2"])
    vec_rows = [bqkv, p["bo"], p["g1"], p["be1"], p["g2"], p["be2"],
                p["b1"], p["b2"], p["g3"], p["be3"]]
    for i, v in enumerate(vec_rows):
        slab = put(slab, ROW_VEC + i, jnp.asarray(v, jnp.float32).reshape(1, -1))
    return slab.astype(jnp.bfloat16)


# -------------------- generation-aware block sizing -------------------------
def _tpu_vmem_bytes():
    try:
        return int(pltpu.get_tpu_info().vmem_capacity_bytes)
    except Exception:
        return 128 * 1024 * 1024     # v5e/v6e default


def _step_vmem_bytes(bb, S):
    """Rough per-grid-step VMEM footprint (double-buffered blocks + live f32 temps)."""
    rows = bb * S
    io = 2 * rows * D_MODEL * 2 + 2 * rows * D_MODEL * 4 + 2 * rows * 2 * 4
    slab = 2 * N_SLAB_ROWS * SLAB_COLS * 2
    interm = rows * SLAB_COLS * 4 * 2        # qkv + ffn hidden (128 lanes, f32)
    interm += rows * D_MODEL * 4 * 8         # ~8 live (rows, D) f32 temporaries
    interm += bb * S * S * 4 * 3             # per-head score / att working set
    return io + slab + interm


def _choose_block_b(B, S):
    """Sequences per grid step, aware of VMEM size / TensorCore count."""
    vmem = _tpu_vmem_bytes()
    two_tc = vmem <= 64 * 1024 * 1024          # v7x-class: 2 TCs, 64 MiB VMEM
    target_rows = 512 if two_tc else 2048      # v5e/v6e: serial grid -> few, large steps
    budget = vmem * (35 if two_tc else 50) // 100
    bb = max(1, min(B, pl.cdiv(target_rows, max(S, 1))))
    while bb > 1 and _step_vmem_bytes(bb, S) > budget:
        bb = max(1, bb // 2)
    # Split across the two TensorCores only if each half still gets >= 256 rows.
    if two_tc and pl.cdiv(B, bb) < 2 and B >= 2 and (B // 2) * S >= 256:
        bb = pl.cdiv(B, 2)
    return bb, vmem


# ------------------------------- wrapper -------------------------------------
def encoder_layer(x, mask_self_att, mask_pad, params):
    """EncoderLayer forward.

    x:             (B, S, D_MODEL) float32
    mask_self_att: broadcastable to (B, S) key mask, 1/True == masked key
    mask_pad:      broadcastable to (B, S) multiplicative query-padding mask
    """
    B, S, D = x.shape
    assert D == D_MODEL
    # TODO(synk): only a per-key padding mask (reshapeable to (B, S)) is
    # supported; a general (B, 1, S, S) attention mask would need a full SxS
    # mask path (RSTNet only ever passes the padding mask).
    key_mask = jnp.asarray(mask_self_att, jnp.float32).reshape(B, S)
    pad_mask = jnp.asarray(mask_pad, jnp.float32).reshape(B, S)
    masks = jnp.stack([pad_mask, key_mask], axis=-1)          # (B, S, 2), one input
    slab = _pack_params(params)

    bb, vmem = _choose_block_b(B, S)
    n_blocks = pl.cdiv(B, bb)
    bb = pl.cdiv(B, n_blocks)                  # rebalance so batch padding is minimal
    Bp = n_blocks * bb

    x_bf = x.astype(jnp.bfloat16)              # bf16 over HBM (bandwidth-bound layer)
    if Bp != B:
        pad = Bp - B
        x_bf = jnp.pad(x_bf, ((0, pad), (0, 0), (0, 0)))
        masks = jnp.pad(masks, ((0, pad), (0, 0), (0, 0)))    # padded rows: mask_pad = 0

    out = pl.pallas_call(
        _encoder_layer_kernel,
        out_shape=jax.ShapeDtypeStruct((Bp, S, D), jnp.float32),
        grid_spec=pltpu.PrefetchScalarGridSpec(
            num_scalar_prefetch=0,
            grid=(n_blocks,),
            in_specs=[
                pl.BlockSpec((bb, S, D), lambda g: (g, 0, 0)),              # x (bf16)
                pl.BlockSpec((bb, S, 2), lambda g: (g, 0, 0)),              # packed masks
                pl.BlockSpec((N_SLAB_ROWS, SLAB_COLS), lambda g: (0, 0)),   # params, fetched once
            ],
            out_specs=pl.BlockSpec((bb, S, D), lambda g: (g, 0, 0)),
        ),
        compiler_params=pltpu.CompilerParams(
            dimension_semantics=("parallel",),
            vmem_limit_bytes=int(min(vmem * 3 // 4, 112 * 1024 * 1024)),
        ),
    )(x_bf, masks, slab)
    return out[:B]


# ----------------------------- pure-JAX reference ---------------------------
def encoder_layer_ref(x, mask_self_att, mask_pad, p):
    B, S, D = x.shape
    q = (x @ p["wq"] + p["bq"]).reshape(B, S, N_HEADS, D_K).transpose(0, 2, 1, 3)
    k = (x @ p["wk"] + p["bk"]).reshape(B, S, N_HEADS, D_K).transpose(0, 2, 3, 1)
    v = (x @ p["wv"] + p["bv"]).reshape(B, S, N_HEADS, D_V).transpose(0, 2, 1, 3)
    att = jnp.matmul(q, k) / jnp.sqrt(jnp.float32(D_K))
    att = jnp.where(mask_self_att > 0.5, -jnp.inf, att)
    att = jax.nn.softmax(att, axis=-1)
    o = jnp.matmul(att, v).transpose(0, 2, 1, 3).reshape(B, S, N_HEADS * D_V)
    o = o @ p["wo"] + p["bo"]
    att_out = _layer_norm(x + o, p["g1"], p["be1"])
    sa = _layer_norm(x + att_out, p["g2"], p["be2"])
    sa = sa * mask_pad
    h1 = jnp.maximum(sa @ p["w1"] + p["b1"], 0.0)
    h2 = h1 @ p["w2"] + p["b2"]
    ff = _layer_norm(sa + h2, p["g3"], p["be3"])
    return ff * mask_pad


def make_params(key):
    ks = jax.random.split(key, 12)
    def w(k, shape, s=0.05):
        return (s * jax.random.normal(k, shape)).astype(jnp.float32)
    return {
        "wq": w(ks[0], (D_MODEL, N_HEADS * D_K)), "bq": w(ks[1], (1, N_HEADS * D_K)),
        "wk": w(ks[2], (D_MODEL, N_HEADS * D_K)), "bk": w(ks[3], (1, N_HEADS * D_K)),
        "wv": w(ks[4], (D_MODEL, N_HEADS * D_V)), "bv": w(ks[5], (1, N_HEADS * D_V)),
        "wo": w(ks[6], (N_HEADS * D_V, D_MODEL)), "bo": w(ks[7], (1, D_MODEL)),
        "g1": jnp.ones((1, D_MODEL), jnp.float32), "be1": jnp.zeros((1, D_MODEL), jnp.float32),
        "g2": jnp.ones((1, D_MODEL), jnp.float32), "be2": jnp.zeros((1, D_MODEL), jnp.float32),
        "w1": w(ks[8], (D_MODEL, D_FF)), "b1": w(ks[9], (1, D_FF)),
        "w2": w(ks[10], (D_FF, D_MODEL)), "b2": w(ks[11], (1, D_MODEL)),
        "g3": jnp.ones((1, D_MODEL), jnp.float32), "be3": jnp.zeros((1, D_MODEL), jnp.float32),
    }


if __name__ == "__main__":
    B, S = 2, 8
    key = jax.random.PRNGKey(0)
    kx, kp = jax.random.split(key)
    x = jax.random.normal(kx, (B, S, D_MODEL), dtype=jnp.float32)
    params = make_params(kp)

    # padding-style masks: valid lengths per batch element
    lens = jnp.array([8, 6], dtype=jnp.int32)
    pos = jnp.arange(S)
    key_masked = (pos[None, :] >= lens[:, None]).astype(jnp.float32)            # (B, S)
    mask_self_att = key_masked[:, None, None, :]                                # (B,1,1,S)
    mask_pad = (pos[None, :] < lens[:, None]).astype(jnp.float32)[..., None]    # (B,S,1)

    out = encoder_layer(x, mask_self_att, mask_pad, params)
    out = jax.block_until_ready(out)

    ref = encoder_layer_ref(x, mask_self_att, mask_pad, params)
    assert out.shape == (B, S, D_MODEL)
    assert bool(jnp.all(jnp.isfinite(out)))
    # bf16 HBM storage / MXU operands + approx reciprocal -> ~0.5% expected deviation
    assert bool(jnp.allclose(out, ref, atol=2e-2, rtol=2e-2))
    print("KERNEL_OK")
</pallas_src>

<mosaic_0001>
module attributes {stable_mosaic.version = 11 : i64} {
  func.func @_encoder_layer_kernel(%arg0: i32, %arg1: memref<2x8x32xbf16, #tpu.memory_space<vmem>>, %arg2: memref<2x8x2xf32, #tpu.memory_space<vmem>>, %arg3: memref<240x128xbf16, #tpu.memory_space<vmem>>, %arg4: memref<2x8x32xf32, #tpu.memory_space<vmem>>) attributes {dimension_semantics = [#tpu.dimension_semantics<parallel>], iteration_bounds = array<i64: 1>, scalar_prefetch = 0 : i64, scratch_operands = 0 : i64, tpu.core_type = #tpu.core_type<tc>, window_params = [{transform_indices = @transform_0, window_bounds = array<i64: 2, 8, 32>}, {transform_indices = @transform_1, window_bounds = array<i64: 2, 8, 2>}, {pipeline_mode = #tpu.pipeline_mode<synchronous>, transform_indices = @transform_2, window_bounds = array<i64: 240, 128>}, {transform_indices = @transform_3, window_bounds = array<i64: 2, 8, 32>}]} {
    %c0 = arith.constant 0 : index
    %c0_0 = arith.constant 0 : index
    %c0_1 = arith.constant 0 : index
    %0 = vector.load %arg1[%c0, %c0_0, %c0_1] : memref<2x8x32xbf16, #tpu.memory_space<vmem>>, vector<2x8x32xbf16>
    %1 = vector.shape_cast %0 : vector<2x8x32xbf16> to vector<16x32xbf16>
    %2 = arith.extf %1 : vector<16x32xbf16> to vector<16x32xf32>
    %c0_2 = arith.constant 0 : index
    %c0_3 = arith.constant 0 : index
    %c0_4 = arith.constant 0 : index
    %3 = vector.load %arg2[%c0_2, %c0_3, %c0_4] : memref<2x8x2xf32, #tpu.memory_space<vmem>>, vector<2x8x2xf32>
    %4 = vector.extract_strided_slice %3 {offsets = [0, 0, 0], sizes = [2, 8, 1], strides = [1, 1, 1]} : vector<2x8x2xf32> to vector<2x8x1xf32>
    %5 = vector.shape_cast %4 : vector<2x8x1xf32> to vector<16x1xf32>
    %6 = vector.extract_strided_slice %3 {offsets = [0, 0, 1], sizes = [2, 8, 1], strides = [1, 1, 1]} : vector<2x8x2xf32> to vector<2x8x1xf32>
    %cst = arith.constant -1.000000e+30 : f32
    %7 = vector.broadcast %cst : f32 to vector<2x8x1xf32>
    %8 = arith.mulf %6, %7 : vector<2x8x1xf32>
    %cst_5 = arith.constant 1.000000e+00 : f32
    %9 = vector.broadcast %cst_5 : f32 to vector<2x8x1xf32>
    %c0_6 = arith.constant 0 : index
    %c0_7 = arith.constant 0 : index
    %10 = vector.load %arg3[%c0_6, %c0_7] : memref<240x128xbf16, #tpu.memory_space<vmem>>, vector<32x128xbf16>
    %c32 = arith.constant 32 : index
    %c0_8 = arith.constant 0 : index
    %11 = vector.load %arg3[%c32, %c0_8] : memref<240x128xbf16, #tpu.memory_space<vmem>>, vector<32x128xbf16>
    %c64 = arith.constant 64 : index
    %c0_9 = arith.constant 0 : index
    %12 = vector.load %arg3[%c64, %c0_9] : memref<240x128xbf16, #tpu.memory_space<vmem>>, vector<32x128xbf16>
    %c96 = arith.constant 96 : index
    %c0_10 = arith.constant 0 : index
    %13 = vector.load %arg3[%c96, %c0_10] : memref<240x128xbf16, #tpu.memory_space<vmem>>, vector<128x128xbf16>
    %c224 = arith.constant 224 : index
    %c0_11 = arith.constant 0 : index
    %14 = vector.load %arg3[%c224, %c0_11] : memref<240x128xbf16, #tpu.memory_space<vmem>>, vector<1x128xbf16>
    %15 = arith.extf %14 : vector<1x128xbf16> to vector<1x128xf32>
    %c225 = arith.constant 225 : index
    %c0_12 = arith.constant 0 : index
    %16 = vector.load %arg3[%c225, %c0_12] : memref<240x128xbf16, #tpu.memory_space<vmem>>, vector<1x128xbf16>
    %17 = arith.extf %16 : vector<1x128xbf16> to vector<1x128xf32>
    %c230 = arith.constant 230 : index
    %c0_13 = arith.constant 0 : index
    %18 = vector.load %arg3[%c230, %c0_13] : memref<240x128xbf16, #tpu.memory_space<vmem>>, vector<1x128xbf16>
    %19 = arith.extf %18 : vector<1x128xbf16> to vector<1x128xf32>
    %c231 = arith.constant 231 : index
    %c0_14 = arith.constant 0 : index
    %20 = vector.load %arg3[%c231, %c0_14] : memref<240x128xbf16, #tpu.memory_space<vmem>>, vector<1x128xbf16>
    %21 = arith.extf %20 : vector<1x128xbf16> to vector<1x128xf32>
    %c226 = arith.constant 226 : index
    %c0_15 = arith.constant 0 : index
    %22 = vector.load %arg3[%c226, %c0_15] : memref<240x128xbf16, #tpu.memory_space<vmem>>, vector<1x128xbf16>
    %23 = arith.extf %22 : vector<1x128xbf16> to vector<1x128xf32>
    %24 = vector.extract_strided_slice %23 {offsets = [0, 0], sizes = [1, 32], strides = [1, 1]} : vector<1x128xf32> to vector<1x32xf32>
    %c227 = arith.constant 227 : index
    %c0_16 = arith.constant 0 : index
    %25 = vector.load %arg3[%c227, %c0_16] : memref<240x128xbf16, #tpu.memory_space<vmem>>, vector<1x128xbf16>
    %26 = arith.extf %25 : vector<1x128xbf16> to vector<1x128xf32>
    %27 = vector.extract_strided_slice %26 {offsets = [0, 0], sizes = [1, 32], strides = [1, 1]} : vector<1x128xf32> to vector<1x32xf32>
    %c228 = arith.constant 228 : index
    %c0_17 = arith.constant 0 : index
    %28 = vector.load %arg3[%c228, %c0_17] : memref<240x128xbf16, #tpu.memory_space<vmem>>, vector<1x128xbf16>
    %29 = arith.extf %28 : vector<1x128xbf16> to vector<1x128xf32>
    %30 = vector.extract_strided_slice %29 {offsets = [0, 0], sizes = [1, 32], strides = [1, 1]} : vector<1x128xf32> to vector<1x32xf32>
    %c229 = arith.constant 229 : index
    %c0_18 = arith.constant 0 : index
    %31 = vector.load %arg3[%c229, %c0_18] : memref<240x128xbf16, #tpu.memory_space<vmem>>, vector<1x128xbf16>
    %32 = arith.extf %31 : vector<1x128xbf16> to vector<1x128xf32>
    %33 = vector.extract_strided_slice %32 {offsets = [0, 0], sizes = [1, 32], strides = [1, 1]} : vector<1x128xf32> to vector<1x32xf32>
    %c232 = arith.constant 232 : index
    %c0_19 = arith.constant 0 : index
    %34 = vector.load %arg3[%c232, %c0_19] : memref<240x128xbf16, #tpu.memory_space<vmem>>, vector<1x128xbf16>
    %35 = arith.extf %34 : vector<1x128xbf16> to vector<1x128xf32>
    %36 = vector.extract_strided_slice %35 {offsets = [0, 0], sizes = [1, 32], strides = [1, 1]} : vector<1x128xf32> to vector<1x32xf32>
    %c233 = arith.constant 233 : index
    %c0_20 = arith.constant 0 : index
    %37 = vector.load %arg3[%c233, %c0_20] : memref<240x128xbf16, #tpu.memory_space<vmem>>, vector<1x128xbf16>
    %38 = arith.extf %37 : vector<1x128xbf16> to vector<1x128xf32>
    %39 = vector.extract_strided_slice %38 {offsets = [0, 0], sizes = [1, 32], strides = [1, 1]} : vector<1x128xf32> to vector<1x32xf32>
    %cst_21 = arith.constant dense<0.000000e+00> : vector<16x128xf32>
    %40 = tpu.matmul %1, %10, %cst_21 {dimension_numbers = #tpu.dot_dimension_numbers<[1], [0], [0], [1], [0, 0, 1, 1], [], []>} : vector<16x32xbf16>, vector<32x128xbf16>, vector<16x128xf32> -> vector<16x128xf32>
    %41 = vector.broadcast %15 : vector<1x128xf32> to vector<16x128xf32>
    %42 = arith.addf %40, %41 : vector<16x128xf32>
    %43 = vector.shape_cast %42 : vector<16x128xf32> to vector<2x8x128xf32>
    %44 = vector.extract_strided_slice %43 {offsets = [0, 0, 0], sizes = [2, 8, 8], strides = [1, 1, 1]} : vector<2x8x128xf32> to vector<2x8x8xf32>
    %45 = vector.extract_strided_slice %43 {offsets = [0, 0, 32], sizes = [2, 8, 8], strides = [1, 1, 1]} : vector<2x8x128xf32> to vector<2x8x8xf32>
    %46 = vector.extract_strided_slice %43 {offsets = [0, 0, 64], sizes = [2, 8, 8], strides = [1, 1, 1]} : vector<2x8x128xf32> to vector<2x8x8xf32>
    %47 = tpu.concatenate %44, %9 in 2 : vector<2x8x8xf32>, vector<2x8x1xf32> -> vector<2x8x9xf32>
    %48 = tpu.concatenate %45, %8 in 2 : vector<2x8x8xf32>, vector<2x8x1xf32> -> vector<2x8x9xf32>
    "tpu.trace_start"() <{level = 10 : i32, message = "bqd,bkd->bqk"}> : () -> ()
    %cst_22 = arith.constant dense<0.000000e+00> : vector<2x8x8xf32>
    %49 = tpu.matmul %47, %48, %cst_22 {dimension_numbers = #tpu.dot_dimension_numbers<[2], [2], [1], [1], [0, 0, 0, 1, 1, 1], [0], [0]>} : vector<2x8x9xf32>, vector<2x8x9xf32>, vector<2x8x8xf32> -> vector<2x8x8xf32>
    "tpu.trace_stop"() : () -> ()
    %cst_23 = arith.constant dense<0xFF800000> : vector<2x8xf32>
    %50 = vector.multi_reduction <maximumf>, %49, %cst_23 [2] : vector<2x8x8xf32> to vector<2x8xf32>
    %51 = vector.shape_cast %50 : vector<2x8xf32> to vector<2x8x1xf32>
    %52 = vector.broadcast %51 : vector<2x8x1xf32> to vector<2x8x8xf32>
    %53 = arith.subf %49, %52 : vector<2x8x8xf32>
    %54 = math.exp %53 : vector<2x8x8xf32>
    %cst_24 = arith.constant dense<0.000000e+00> : vector<2x8xf32>
    %55 = vector.multi_reduction <add>, %54, %cst_24 [2] : vector<2x8x8xf32> to vector<2x8xf32>
    %56 = vector.shape_cast %55 : vector<2x8xf32> to vector<2x8x1xf32>
    %57 = tpu.reciprocal %56 {approx = true} : vector<2x8x1xf32> -> vector<2x8x1xf32>
    %58 = vector.broadcast %57 : vector<2x8x1xf32> to vector<2x8x8xf32>
    %59 = arith.mulf %54, %58 : vector<2x8x8xf32>
    "tpu.trace_start"() <{level = 10 : i32, message = "bqk,bkd->bqd"}> : () -> ()
    %cst_25 = arith.constant dense<0.000000e+00> : vector<2x8x8xf32>
    %60 = tpu.matmul %59, %46, %cst_25 {dimension_numbers = #tpu.dot_dimension_numbers<[2], [1], [1], [2], [0, 0, 0, 1, 1, 2], [0], [0]>} : vector<2x8x8xf32>, vector<2x8x8xf32>, vector<2x8x8xf32> -> vector<2x8x8xf32>
    "tpu.trace_stop"() : () -> ()
    %61 = vector.extract_strided_slice %43 {offsets = [0, 0, 8], sizes = [2, 8, 8], strides = [1, 1, 1]} : vector<2x8x128xf32> to vector<2x8x8xf32>
    %62 = vector.extract_strided_slice %43 {offsets = [0, 0, 40], sizes = [2, 8, 8], strides = [1, 1, 1]} : vector<2x8x128xf32> to vector<2x8x8xf32>
    %63 = vector.extract_strided_slice %43 {offsets = [0, 0, 72], sizes = [2, 8, 8], strides = [1, 1, 1]} : vector<2x8x128xf32> to vector<2x8x8xf32>
    %64 = tpu.concatenate %61, %9 in 2 : vector<2x8x8xf32>, vector<2x8x1xf32> -> vector<2x8x9xf32>
    %65 = tpu.concatenate %62, %8 in 2 : vector<2x8x8xf32>, vector<2x8x1xf32> -> vector<2x8x9xf32>
    "tpu.trace_start"() <{level = 10 : i32, message = "bqd,bkd->bqk"}> : () -> ()
    %cst_26 = arith.constant dense<0.000000e+00> : vector<2x8x8xf32>
    %66 = tpu.matmul %64, %65, %cst_26 {dimension_numbers = #tpu.dot_dimension_numbers<[2], [2], [1], [1], [0, 0, 0, 1, 1, 1], [0], [0]>} : vector<2x8x9xf32>, vector<2x8x9xf32>, vector<2x8x8xf32> -> vector<2x8x8xf32>
    "tpu.trace_stop"() : () -> ()
    %cst_27 = arith.constant dense<0xFF800000> : vector<2x8xf32>
    %67 = vector.multi_reduction <maximumf>, %66, %cst_27 [2] : vector<2x8x8xf32> to vector<2x8xf32>
    %68 = vector.shape_cast %67 : vector<2x8xf32> to vector<2x8x1xf32>
    %69 = vector.broadcast %68 : vector<2x8x1xf32> to vector<2x8x8xf32>
    %70 = arith.subf %66, %69 : vector<2x8x8xf32>
    %71 = math.exp %70 : vector<2x8x8xf32>
    %cst_28 = arith.constant dense<0.000000e+00> : vector<2x8xf32>
    %72 = vector.multi_reduction <add>, %71, %cst_28 [2] : vector<2x8x8xf32> to vector<2x8xf32>
    %73 = vector.shape_cast %72 : vector<2x8xf32> to vector<2x8x1xf32>
    %74 = tpu.reciprocal %73 {approx = true} : vector<2x8x1xf32> -> vector<2x8x1xf32>
    %75 = vector.broadcast %74 : vector<2x8x1xf32> to vector<2x8x8xf32>
    %76 = arith.mulf %71, %75 : vector<2x8x8xf32>
    "tpu.trace_start"() <{level = 10 : i32, message = "bqk,bkd->bqd"}> : () -> ()
    %cst_29 = arith.constant dense<0.000000e+00> : vector<2x8x8xf32>
    %77 = tpu.matmul %76, %63, %cst_29 {dimension_numbers = #tpu.dot_dimension_numbers<[2], [1], [1], [2], [0, 0, 0, 1, 1, 2], [0], [0]>} : vector<2x8x8xf32>, vector<2x8x8xf32>, vector<2x8x8xf32> -> vector<2x8x8xf32>
    "tpu.trace_stop"() : () -> ()
    %78 = vector.extract_strided_slice %43 {offsets = [0, 0, 16], sizes = [2, 8, 8], strides = [1, 1, 1]} : vector<2x8x128xf32> to vector<2x8x8xf32>
    %79 = vector.extract_strided_slice %43 {offsets = [0, 0, 48], sizes = [2, 8, 8], strides = [1, 1, 1]} : vector<2x8x128xf32> to vector<2x8x8xf32>
    %80 = vector.extract_strided_slice %43 {offsets = [0, 0, 80], sizes = [2, 8, 8], strides = [1, 1, 1]} : vector<2x8x128xf32> to vector<2x8x8xf32>
    %81 = tpu.concatenate %78, %9 in 2 : vector<2x8x8xf32>, vector<2x8x1xf32> -> vector<2x8x9xf32>
    %82 = tpu.concatenate %79, %8 in 2 : vector<2x8x8xf32>, vector<2x8x1xf32> -> vector<2x8x9xf32>
    "tpu.trace_start"() <{level = 10 : i32, message = "bqd,bkd->bqk"}> : () -> ()
    %cst_30 = arith.constant dense<0.000000e+00> : vector<2x8x8xf32>
    %83 = tpu.matmul %81, %82, %cst_30 {dimension_numbers = #tpu.dot_dimension_numbers<[2], [2], [1], [1], [0, 0, 0, 1, 1, 1], [0], [0]>} : vector<2x8x9xf32>, vector<2x8x9xf32>, vector<2x8x8xf32> -> vector<2x8x8xf32>
    "tpu.trace_stop"() : () -> ()
    %cst_31 = arith.constant dense<0xFF800000> : vector<2x8xf32>
    %84 = vector.multi_reduction <maximumf>, %83, %cst_31 [2] : vector<2x8x8xf32> to vector<2x8xf32>
    %85 = vector.shape_cast %84 : vector<2x8xf32> to vector<2x8x1xf32>
    %86 = vector.broadcast %85 : vector<2x8x1xf32> to vector<2x8x8xf32>
    %87 = arith.subf %83, %86 : vector<2x8x8xf32>
    %88 = math.exp %87 : vector<2x8x8xf32>
    %cst_32 = arith.constant dense<0.000000e+00> : vector<2x8xf32>
    %89 = vector.multi_reduction <add>, %88, %cst_32 [2] : vector<2x8x8xf32> to vector<2x8xf32>
    %90 = vector.shape_cast %89 : vector<2x8xf32> to vector<2x8x1xf32>
    %91 = tpu.reciprocal %90 {approx = true} : vector<2x8x1xf32> -> vector<2x8x1xf32>
    %92 = vector.broadcast %91 : vector<2x8x1xf32> to vector<2x8x8xf32>
    %93 = arith.mulf %88, %92 : vector<2x8x8xf32>
    "tpu.trace_start"() <{level = 10 : i32, message = "bqk,bkd->bqd"}> : () -> ()
    %cst_33 = arith.constant dense<0.000000e+00> : vector<2x8x8xf32>
    %94 = tpu.matmul %93, %80, %cst_33 {dimension_numbers = #tpu.dot_dimension_numbers<[2], [1], [1], [2], [0, 0, 0, 1, 1, 2], [0], [0]>} : vector<2x8x8xf32>, vector<2x8x8xf32>, vector<2x8x8xf32> -> vector<2x8x8xf32>
    "tpu.trace_stop"() : () -> ()
    %95 = vector.extract_strided_slice %43 {offsets = [0, 0, 24], sizes = [2, 8, 8], strides = [1, 1, 1]} : vector<2x8x128xf32> to vector<2x8x8xf32>
    %96 = vector.extract_strided_slice %43 {offsets = [0, 0, 56], sizes = [2, 8, 8], strides = [1, 1, 1]} : vector<2x8x128xf32> to vector<2x8x8xf32>
    %97 = vector.extract_strided_slice %43 {offsets = [0, 0, 88], sizes = [2, 8, 8], strides = [1, 1, 1]} : vector<2x8x128xf32> to vector<2x8x8xf32>
    %98 = tpu.concatenate %95, %9 in 2 : vector<2x8x8xf32>, vector<2x8x1xf32> -> vector<2x8x9xf32>
    %99 = tpu.concatenate %96, %8 in 2 : vector<2x8x8xf32>, vector<2x8x1xf32> -> vector<2x8x9xf32>
    "tpu.trace_start"() <{level = 10 : i32, message = "bqd,bkd->bqk"}> : () -> ()
    %cst_34 = arith.constant dense<0.000000e+00> : vector<2x8x8xf32>
    %100 = tpu.matmul %98, %99, %cst_34 {dimension_numbers = #tpu.dot_dimension_numbers<[2], [2], [1], [1], [0, 0, 0, 1, 1, 1], [0], [0]>} : vector<2x8x9xf32>, vector<2x8x9xf32>, vector<2x8x8xf32> -> vector<2x8x8xf32>
    "tpu.trace_stop"() : () -> ()
    %cst_35 = arith.constant dense<0xFF800000> : vector<2x8xf32>
    %101 = vector.multi_reduction <maximumf>, %100, %cst_35 [2] : vector<2x8x8xf32> to vector<2x8xf32>
    %102 = vector.shape_cast %101 : vector<2x8xf32> to vector<2x8x1xf32>
    %103 = vector.broadcast %102 : vector<2x8x1xf32> to vector<2x8x8xf32>
    %104 = arith.subf %100, %103 : vector<2x8x8xf32>
    %105 = math.exp %104 : vector<2x8x8xf32>
    %cst_36 = arith.constant dense<0.000000e+00> : vector<2x8xf32>
    %106 = vector.multi_reduction <add>, %105, %cst_36 [2] : vector<2x8x8xf32> to vector<2x8xf32>
    %107 = vector.shape_cast %106 : vector<2x8xf32> to vector<2x8x1xf32>
    %108 = tpu.reciprocal %107 {approx = true} : vector<2x8x1xf32> -> vector<2x8x1xf32>
    %109 = vector.broadcast %108 : vector<2x8x1xf32> to vector<2x8x8xf32>
    %110 = arith.mulf %105, %109 : vector<2x8x8xf32>
    "tpu.trace_start"() <{level = 10 : i32, message = "bqk,bkd->bqd"}> : () -> ()
    %cst_37 = arith.constant dense<0.000000e+00> : vector<2x8x8xf32>
    %111 = tpu.matmul %110, %97, %cst_37 {dimension_numbers = #tpu.dot_dimension_numbers<[2], [1], [1], [2], [0, 0, 0, 1, 1, 2], [0], [0]>} : vector<2x8x8xf32>, vector<2x8x8xf32>, vector<2x8x8xf32> -> vector<2x8x8xf32>
    "tpu.trace_stop"() : () -> ()
    %112 = tpu.concatenate %60, %77, %94, %111 in 2 : vector<2x8x8xf32>, vector<2x8x8xf32>, vector<2x8x8xf32>, vector<2x8x8xf32> -> vector<2x8x32xf32>
    %113 = vector.shape_cast %112 : vector<2x8x32xf32> to vector<16x32xf32>
    %114 = arith.truncf %113 : vector<16x32xf32> to vector<16x32xbf16>
    %cst_38 = arith.constant dense<0.000000e+00> : vector<16x128xf32>
    %115 = tpu.matmul %114, %11, %cst_38 {dimension_numbers = #tpu.dot_dimension_numbers<[1], [0], [0], [1], [0, 0, 1, 1], [], []>} : vector<16x32xbf16>, vector<32x128xbf16>, vector<16x128xf32> -> vector<16x128xf32>
    %116 = vector.broadcast %17 : vector<1x128xf32> to vector<16x128xf32>
    %117 = arith.addf %115, %116 : vector<16x128xf32>
    %118 = vector.extract_strided_slice %117 {offsets = [0, 0], sizes = [16, 32], strides = [1, 1]} : vector<16x128xf32> to vector<16x32xf32>
    %119 = arith.addf %2, %118 : vector<16x32xf32>
    %cst_39 = arith.constant dense<0.000000e+00> : vector<16xf32>
    %120 = vector.multi_reduction <add>, %119, %cst_39 [1] : vector<16x32xf32> to vector<16xf32>
    %121 = vector.shape_cast %120 : vector<16xf32> to vector<16x1xf32>
    %cst_40 = arith.constant 3.200000e+01 : f32
    %122 = vector.broadcast %cst_40 : f32 to vector<16x1xf32>
    %123 = arith.divf %121, %122 : vector<16x1xf32>
    %124 = vector.broadcast %123 : vector<16x1xf32> to vector<16x32xf32>
    %125 = arith.subf %119, %124 : vector<16x32xf32>
    %126 = arith.mulf %125, %125 : vector<16x32xf32>
    %cst_41 = arith.constant dense<0.000000e+00> : vector<16xf32>
    %127 = vector.multi_reduction <add>, %126, %cst_41 [1] : vector<16x32xf32> to vector<16xf32>
    %128 = vector.shape_cast %127 : vector<16xf32> to vector<16x1xf32>
    %cst_42 = arith.constant 3.200000e+01 : f32
    %129 = vector.broadcast %cst_42 : f32 to vector<16x1xf32>
    %130 = arith.divf %128, %129 : vector<16x1xf32>
    %131 = vector.broadcast %123 : vector<16x1xf32> to vector<16x32xf32>
    %132 = arith.subf %119, %131 : vector<16x32xf32>
    %cst_43 = arith.constant 9.99999974E-6 : f32
    %133 = vector.broadcast %cst_43 : f32 to vector<16x1xf32>
    %134 = arith.addf %130, %133 : vector<16x1xf32>
    %135 = math.rsqrt %134 : vector<16x1xf32>
    %136 = vector.broadcast %135 : vector<16x1xf32> to vector<16x32xf32>
    %137 = arith.mulf %132, %136 : vector<16x32xf32>
    %138 = vector.broadcast %24 : vector<1x32xf32> to vector<16x32xf32>
    %139 = arith.mulf %137, %138 : vector<16x32xf32>
    %140 = vector.broadcast %27 : vector<1x32xf32> to vector<16x32xf32>
    %141 = arith.addf %139, %140 : vector<16x32xf32>
    %142 = arith.addf %2, %141 : vector<16x32xf32>
    %cst_44 = arith.constant dense<0.000000e+00> : vector<16xf32>
    %143 = vector.multi_reduction <add>, %142, %cst_44 [1] : vector<16x32xf32> to vector<16xf32>
    %144 = vector.shape_cast %143 : vector<16xf32> to vector<16x1xf32>
    %cst_45 = arith.constant 3.200000e+01 : f32
    %145 = vector.broadcast %cst_45 : f32 to vector<16x1xf32>
    %146 = arith.divf %144, %145 : vector<16x1xf32>
    %147 = vector.broadcast %146 : vector<16x1xf32> to vector<16x32xf32>
    %148 = arith.subf %142, %147 : vector<16x32xf32>
    %149 = arith.mulf %148, %148 : vector<16x32xf32>
    %cst_46 = arith.constant dense<0.000000e+00> : vector<16xf32>
    %150 = vector.multi_reduction <add>, %149, %cst_46 [1] : vector<16x32xf32> to vector<16xf32>
    %151 = vector.shape_cast %150 : vector<16xf32> to vector<16x1xf32>
    %cst_47 = arith.constant 3.200000e+01 : f32
    %152 = vector.broadcast %cst_47 : f32 to vector<16x1xf32>
    %153 = arith.divf %151, %152 : vector<16x1xf32>
    %154 = vector.broadcast %146 : vector<16x1xf32> to vector<16x32xf32>
    %155 = arith.subf %142, %154 : vector<16x32xf32>
    %cst_48 = arith.constant 9.99999974E-6 : f32
    %156 = vector.broadcast %cst_48 : f32 to vector<16x1xf32>
    %157 = arith.addf %153, %156 : vector<16x1xf32>
    %158 = math.rsqrt %157 : vector<16x1xf32>
    %159 = vector.broadcast %158 : vector<16x1xf32> to vector<16x32xf32>
    %160 = arith.mulf %155, %159 : vector<16x32xf32>
    %161 = vector.broadcast %30 : vector<1x32xf32> to vector<16x32xf32>
    %162 = arith.mulf %160, %161 : vector<16x32xf32>
    %163 = vector.broadcast %33 : vector<1x32xf32> to vector<16x32xf32>
    %164 = arith.addf %162, %163 : vector<16x32xf32>
    %165 = vector.broadcast %5 : vector<16x1xf32> to vector<16x32xf32>
    %166 = arith.mulf %164, %165 : vector<16x32xf32>
    %167 = arith.truncf %166 : vector<16x32xf32> to vector<16x32xbf16>
    %cst_49 = arith.constant dense<0.000000e+00> : vector<16x128xf32>
    %168 = tpu.matmul %167, %12, %cst_49 {dimension_numbers = #tpu.dot_dimension_numbers<[1], [0], [0], [1], [0, 0, 1, 1], [], []>} : vector<16x32xbf16>, vector<32x128xbf16>, vector<16x128xf32> -> vector<16x128xf32>
    %169 = vector.broadcast %19 : vector<1x128xf32> to vector<16x128xf32>
    %170 = arith.addf %168, %169 : vector<16x128xf32>
    %cst_50 = arith.constant 0.000000e+00 : f32
    %171 = vector.broadcast %cst_50 : f32 to vector<16x128xf32>
    %172 = arith.maximumf %170, %171 : vector<16x128xf32>
    %173 = arith.truncf %172 : vector<16x128xf32> to vector<16x128xbf16>
    %cst_51 = arith.constant dense<0.000000e+00> : vector<16x128xf32>
    %174 = tpu.matmul %173, %13, %cst_51 {dimension_numbers = #tpu.dot_dimension_numbers<[1], [0], [0], [1], [0, 0, 1, 1], [], []>} : vector<16x128xbf16>, vector<128x128xbf16>, vector<16x128xf32> -> vector<16x128xf32>
    %175 = vector.broadcast %21 : vector<1x128xf32> to vector<16x128xf32>
    %176 = arith.addf %174, %175 : vector<16x128xf32>
    %177 = vector.extract_strided_slice %176 {offsets = [0, 0], sizes = [16, 32], strides = [1, 1]} : vector<16x128xf32> to vector<16x32xf32>
    %178 = arith.addf %166, %177 : vector<16x32xf32>
    %cst_52 = arith.constant dense<0.000000e+00> : vector<16xf32>
    %179 = vector.multi_reduction <add>, %178, %cst_52 [1] : vector<16x32xf32> to vector<16xf32>
    %180 = vector.shape_cast %179 : vector<16xf32> to vector<16x1xf32>
    %cst_53 = arith.constant 3.200000e+01 : f32
    %181 = vector.broadcast %cst_53 : f32 to vector<16x1xf32>
    %182 = arith.divf %180, %181 : vector<16x1xf32>
    %183 = vector.broadcast %182 : vector<16x1xf32> to vector<16x32xf32>
    %184 = arith.subf %178, %183 : vector<16x32xf32>
    %185 = arith.mulf %184, %184 : vector<16x32xf32>
    %cst_54 = arith.constant dense<0.000000e+00> : vector<16xf32>
    %186 = vector.multi_reduction <add>, %185, %cst_54 [1] : vector<16x32xf32> to vector<16xf32>
    %187 = vector.shape_cast %186 : vector<16xf32> to vector<16x1xf32>
    %cst_55 = arith.constant 3.200000e+01 : f32
    %188 = vector.broadcast %cst_55 : f32 to vector<16x1xf32>
    %189 = arith.divf %187, %188 : vector<16x1xf32>
    %190 = vector.broadcast %182 : vector<16x1xf32> to vector<16x32xf32>
    %191 = arith.subf %178, %190 : vector<16x32xf32>
    %cst_56 = arith.constant 9.99999974E-6 : f32
    %192 = vector.broadcast %cst_56 : f32 to vector<16x1xf32>
    %193 = arith.addf %189, %192 : vector<16x1xf32>
    %194 = math.rsqrt %193 : vector<16x1xf32>
    %195 = vector.broadcast %194 : vector<16x1xf32> to vector<16x32xf32>
    %196 = arith.mulf %191, %195 : vector<16x32xf32>
    %197 = vector.broadcast %36 : vector<1x32xf32> to vector<16x32xf32>
    %198 = arith.mulf %196, %197 : vector<16x32xf32>
    %199 = vector.broadcast %39 : vector<1x32xf32> to vector<16x32xf32>
    %200 = arith.addf %198, %199 : vector<16x32xf32>
    %201 = vector.broadcast %5 : vector<16x1xf32> to vector<16x32xf32>
    %202 = arith.mulf %200, %201 : vector<16x32xf32>
    %203 = vector.shape_cast %202 : vector<16x32xf32> to vector<2x8x32xf32>
    %c0_57 = arith.constant 0 : index
    %c0_58 = arith.constant 0 : index
    %c0_59 = arith.constant 0 : index
    %204 = vector.load %arg4[%c0_57, %c0_58, %c0_59] : memref<2x8x32xf32, #tpu.memory_space<vmem>>, vector<2x8x32xf32>
    tpu.vector_store %arg4[%c0_57, %c0_58, %c0_59], %203 {strides = array<i32>} : memref<2x8x32xf32, #tpu.memory_space<vmem>>, vector<2x8x32xf32>,
    return
  }
  func.func @transform_0(%arg0: i32) -> (i32, i32, i32) {
    %c0_i32 = arith.constant 0 : i32
    %c0_i32_0 = arith.constant 0 : i32
    %c0_i32_1 = arith.constant 0 : i32
    return %arg0, %c0_i32, %c0_i32_0 : i32, i32, i32
  }
  func.func @transform_1(%arg0: i32) -> (i32, i32, i32) {
    %c0_i32 = arith.constant 0 : i32
    %c0_i32_0 = arith.constant 0 : i32
    %c0_i32_1 = arith.constant 0 : i32
    return %arg0, %c0_i32, %c0_i32_0 : i32, i32, i32
  }
  func.func @transform_2(%arg0: i32) -> (i32, i32) {
    %c0_i32 = arith.constant 0 : i32
    %c0_i32_0 = arith.constant 0 : i32
    %c0_i32_1 = arith.constant 0 : i32
    return %c0_i32, %c0_i32_0 : i32, i32
  }
  func.func @transform_3(%arg0: i32) -> (i32, i32, i32) {
    %c0_i32 = arith.constant 0 : i32
    %c0_i32_0 = arith.constant 0 : i32
    %c0_i32_1 = arith.constant 0 : i32
    return %arg0, %c0_i32, %c0_i32_0 : i32, i32, i32
  }
}

</mosaic_0001>

<bundles_post_ra>
// kernel: tpu_custom_call.1
= control target key start
LH: loop header
LB: loop body
LE: loop exit
PB: predicated region body
PF: predicated region fallthrough
CT: control target
= control target key end

     0   :  { %8 = vsyncpa [#allocation3], 0  ;;  %s2710_s0 = inlined_call_operand.hbm [shape: bf16[2,8,32], index: 0, kind: input, shape index: {}]   ;;  %s2711_s1 = inlined_call_operand.hbm [shape: f32[2,8,2], index: 1, kind: input, shape index: {}]   ;;  %s2712_s2 = inlined_call_operand.hbm [shape: bf16[240,128], index: 2, kind: input, shape index: {}]   ;;  %s2713_s3 = inlined_call_operand.hbm [shape: f32[2,8,32], index: 3, kind: output, shape index: {}]  }
   0x1   :  { %9 = vsyncpa [#allocation6], 0 }
   0x2   :  { %10 = vsyncpa [#allocation4], 0  ;;  %s2359_s12 = smov [#allocation5]   ;;  %s2265_s16 = scalar_lea.hbm %s2711_s1, 256 }
   0x3   :  { %s28_s13 = sshll.u32 %s2359_s12, 4  ;;  %p2266_p0 = scmp.ne.s32.totalorder %s2711_s1, %s2265_s16  ;;  %s29_s13 = int_to_ptr.vmem [resolvable:$true] %s28_s13 }
   0x4   :  { %p2269_p1 = scmp.lt.u32.totalorder %s2265_s16, %s2711_s1 }
   0x6   :  { %p2271_p2 = pnand %p2269_p1, %p2266_p0 }
   0x8   :  { %2274 = shalt.err (!%p2271_p2)
}
   0x9   :  { %s2275_s21 = scalar_lea.vmem %s29_s13, 256  ;;  %p2280_p4 = scmp.lt.s32.totalorder %s29_s13, %s29_s13 }
   0xa   :  { %p2276_p3 = scmp.ne.s32.totalorder %s29_s13, %s2275_s21  ;;  %p2281_p5 = scmp.lt.s32.totalorder %s2275_s21, %s2275_s21 }
   0xc   :  { %p2282_p6 = por %p2281_p5, %p2280_p4 }
   0xe   :  { %p2283_p7 = pnand %p2282_p6, %p2276_p3 }
  0x10   :  { %2286 = shalt.err (!%p2283_p7)
}
  0x11   :  { %s2360_s22 = smov 128   ;;  %s2361_s23 = smov 8  }
  0x12   :  { %34 = dma.hbm_to_vmem [thread:$0]  %s2711_s1, 256, %s29_s13, [#allocation6], %s2360_s22, %s2360_s22, %s2361_s23  }
  0x13   :  { %s2362_s26 = smov [#allocation2]   ;;  %s2287_s30 = scalar_lea.hbm %s2710_s0, 128 }
  0x14   :  { %s16_s27 = sshll.u32 %s2362_s26, 4  ;;  %p2288_p8 = scmp.ne.s32.totalorder %s2710_s0, %s2287_s30  ;;  %s17_s27 = int_to_ptr.vmem [resolvable:$true] %s16_s27 }
  0x15   :  { %p2291_p9 = scmp.lt.u32.totalorder %s2287_s30, %s2710_s0 }
  0x17   :  { %p2293_p10 = pnand %p2291_p9, %p2288_p8 }
  0x19   :  { %2296 = shalt.err (!%p2293_p10)
}
  0x1a   :  { %s2297_s8 = scalar_lea.vmem %s17_s27, 128  ;;  %p2302_p12 = scmp.lt.s32.totalorder %s17_s27, %s17_s27 }
  0x1b   :  { %p2298_p11 = scmp.ne.s32.totalorder %s17_s27, %s2297_s8  ;;  %p2303_p13 = scmp.lt.s32.totalorder %s2297_s8, %s2297_s8 }
  0x1d   :  { %p2304_p0 = por %p2303_p13, %p2302_p12 }
  0x1f   :  { %p2305_p1 = pnand %p2304_p0, %p2298_p11 }
  0x21   :  { %2308 = shalt.err (!%p2305_p1)
}
  0x22   :  { %s2363_s1 = smov 64   ;;  %s2364_s9 = smov 4  }
  0x23   :  { %22 = dma.hbm_to_vmem [thread:$0]  %s2710_s0, 128, %s17_s27, [#allocation3], %s2363_s1, %s2363_s1, %s2364_s9  }
  0x24   :  { %s2365_s12 = smov [#allocation7]   ;;  %s2309_s16 = scalar_lea.hbm %s2712_s2, 1920 }
  0x25   :  { %s40_s13 = sshll.u32 %s2365_s12, 4  ;;  %p2310_p2 = scmp.ne.s32.totalorder %s2712_s2, %s2309_s16  ;;  %s41_s13 = int_to_ptr.vmem [resolvable:$true] %s40_s13 }
  0x26   :  { %p2313_p3 = scmp.lt.u32.totalorder %s2309_s16, %s2712_s2 }
  0x28   :  { %p2315_p4 = pnand %p2313_p3, %p2310_p2 }
  0x2a   :  { %2318 = shalt.err (!%p2315_p4)
}
  0x2b   :  { %s2319_s21 = scalar_lea.vmem %s41_s13, 1920  ;;  %p2324_p6 = scmp.lt.s32.totalorder %s41_s13, %s41_s13 }
  0x2c   :  { %p2320_p5 = scmp.ne.s32.totalorder %s41_s13, %s2319_s21  ;;  %p2325_p7 = scmp.lt.s32.totalorder %s2319_s21, %s2319_s21 }
  0x2e   :  { %p2326_p8 = por %p2325_p7, %p2324_p6 }
  0x30   :  { %p2327_p9 = pnand %p2326_p8, %p2320_p5 }
  0x32   :  { %2330 = shalt.err (!%p2327_p9)
}
  0x33   :  { %46 = dma.hbm_to_vmem [thread:$0]  %s2712_s2, 1920, %s41_s13, [#allocation6], %s2363_s1, %s2363_s1, %s2364_s9  }
  0x34   :  { %2353 = dma.done.wait [#allocation3], 128  }
  0x35   :  { %2354 = vsyncadd [#allocation3], 4294967168 }
  0x36   :  { %2355 = dma.done.wait [#allocation6], 2176  }
  0x37   :  { %2356 = vsyncadd [#allocation6], 4294965120  ;;  %v2366_v0 = vmov 0.0   ;;  %vm2367_vm0 = vmmov 0   ;;  %v2205_v1 = vld [vmem:[#allocation7] sm:$0xff]   ;;  %v2206_v2 = vld [vmem:[#allocation7 + $0x8] sm:$0xff]   ;;  %v103_v8 = vlaneseq }
  0x38   :  { %2040 = vmatprep.subr.bf16.mxu0 %v2366_v0  ;;  %2044 = vmatprep.mubr.msk.bf16.mxu0 %vm2367_vm0, %v2366_v0  ;;  %v2452_v3 = vld [vmem:[#allocation2] sm:$0xff]   ;;  %vm124_vm1 = vcmask 261120   ;;  %v2460_v4 = vld [vmem:[#allocation5] sm:$0xff]  ;;  %s2368_s2 = smov 7   ;;  %v2463_v6 = vld [vmem:[#allocation5 + $0x8] sm:$0xff]  ;;  %s2369_s25 = smov 96  }
  0x39   :  { %2053 = vmatprep.subr.mxu1 %v2366_v0  ;;  %2055 = vmatprep.mubr.msk.f32.mxu1 %vm2367_vm0, %v2366_v0  ;;  %v63_v5 = vmul.f32 -1e+30, %v2460_v4  ;;  %v64_v7 = vmul.f32 -1e+30, %v2463_v6  ;;  %v2466_v9 = vshrl.u32 %v103_v8, 7  ;;  %vm190_vm2 = vcmask 72704  }
  0x3a   :  { %2041 = vmatpush3.bf16.msra.mxu0 %v2205_v1  ;;  %v2468_v10 = vld [vmem:[#allocation7 + $0x70] sm:$0x1]  ;;  %vm169_vm3 = vcmask 64512   ;;  %s2370_s26 = smov 88   ;;  %s2371_s27 = smov 120   ;;  %vm1569_vm4 = vcmask 130048  }
  0x3b   :  { %2042 = vmatprep.subr.bf16.mxu0 %v2366_v0  ;;  %182 = vrot.lane.b32.xlu1 %v63_v5, %s2368_s2  ;;  %v94_v11 = vunpack.c.l.bf16 %v2468_v10  ;;  %v105_v12 = vsub.s32 0, %v2466_v9  ;;  %s2372_s28 = smov 56   ;;  %s2373_s29 = smov 80   ;;  %vm1572_vm5 = vcmask 195584  }
  0x3c   :  { %s2374_s30 = smov 112   ;;  %s2375_s4 = smov 48  }
  0x3d   :  { %v106_v13 = vrot.slane %v94_v11, %v105_v12  ;;  %s2376_s5 = smov 72   ;;  %s2377_s6 = smov 104  }
  0x3e   :  { %2043 = vmatpush3.bf16.msra.mxu0 %v2206_v2  ;;  %s2378_s7 = smov 40   ;;  %s2379_s8 = smov 16  }
  0x3f   :  { %2048 = vmatprep.subr.mxu0 %v2366_v0  ;;  %184 = vrot.lane.b32.xlu1 %v64_v7, %s2368_s2  ;;  %s2382_s9 = smov [#allocation8]  }
  0x40   :  { %s1935_s10 = sshll.u32 %s2382_s9, 4  ;;  %s1936_s10 = int_to_ptr.vmem [resolvable:$true] %s1935_s10 }
  0x41   :  { %2045 = vmatmul.mubr.msk.bf16.vlgmr.msra.gmra.mrb[0].mxu0 %vm124_vm1, %v2452_v3  ;;  %s2331_s11 = scalar_lea.vmem %s1936_s10, 256  ;;  %p2336_p11 = scmp.lt.s32.totalorder %s1936_s10, %s1936_s10 }
  0x42   :  { %2050 = vmatprep.mubr.msk.f32.mxu0 %vm2367_vm0, %v2366_v0  ;;  %p2332_p10 = scmp.ne.s32.totalorder %s1936_s10, %s2331_s11  ;;  %p2337_p12 = scmp.lt.s32.totalorder %s2331_s11, %s2331_s11 }
  0x44   :  { %p2338_p13 = por %p2337_p12, %p2336_p11 }
  0x46   :  { %p2339_p0 = pnand %p2338_p13, %p2332_p10 }
  0xad   :  { %v2482_v20 = vpop.permute.xlu1 %182 }
  0xb1   :  { %v2487_v23 = vpop.permute.xlu1 %184 }
 0x114   :  { %v162_v14 = vpop.f32.mrb[0].mxu0 }
 0x115   :  { %v2476_v15 = vadd.f32 %v162_v14, %v106_v13  ;;  %v2046_v16 = vpop.f32.mrb[1].mxu0 }
 0x116   :  { %v165_v17 = vpop.f32.mrb[2].mxu0 }
 0x117   :  { %174 = vrot.lane.b32.xlu0 %v2476_v15, %s2369_s25  ;;  %v2047_v18 = vpop.f32.mrb[3].mxu0  ;;  %v2479_v19 = vadd.f32 %v165_v17, %v106_v13  ;;  %v170_v25 = vsel %vm169_vm3, %v2476_v15, 1.0 }
 0x119   :  { %v171_v27 = vsel %vm169_vm3, %v2479_v19, 1.0 }
 0x11b   :  { %176 = vrot.lane.b32.xlu0 %v2479_v19, %s2369_s25 }
 0x189   :  { %v175_v21 = vpop.permute.xlu0 %174 }
 0x18a   :  { %v188_v22 = vsel %vm169_vm3, %v175_v21, %v2482_v20 }
 0x18b   :  { %2049 = vmatpush3.xpose.msk.msra.mxu0 %vm190_vm2, %v188_v22 }
 0x18c   :  { %2063 = vmatprep.subr.mxu0 %v2366_v0 }
 0x18d   :  { %v177_v24 = vpop.permute.xlu0 %176 }
 0x18e   :  { %2051 = vmatmul.mubr.msk.f32.vlgmr.msra.gmra.mrb[4].mxu0 %vm190_vm2, %v170_v25  ;;  %v189_v26 = vsel %vm169_vm3, %v177_v24, %v2487_v23 }
 0x18f   :  { %2054 = vmatpush3.xpose.msk.msra.mxu1 %vm190_vm2, %v189_v26  ;;  %2065 = vmatprep.mubr.msk.f32.mxu0 %vm2367_vm0, %v2366_v0 }
 0x190   :  { %2058 = vmatprep.subr.mxu1 %v2366_v0 }
 0x192   :  { %2056 = vmatmul.mubr.msk.f32.vlgmr.msra.gmra.mrb[0].mxu1 %vm190_vm2, %v171_v27 }
 0x193   :  { %2060 = vmatprep.mubr.msk.f32.mxu1 %vm2367_vm0, %v2366_v0 }
 0x261   :  { %v263_v28 = vpop.f32.mrb[4].mxu0 }
 0x262   :  { %v2052_v29 = vpop.f32.mrb[5].mxu0  ;;  %v343_v30 = vsel %vm169_vm3, %v263_v28, -inf }
 0x263   :  { %344 = vmax.xlane.f32.xlu0 %v343_v30 }
 0x265   :  { %v339_v31 = vpop.f32.mrb[0].mxu1 }
 0x266   :  { %v2057_v32 = vpop.f32.mrb[1].mxu1  ;;  %v346_v33 = vsel %vm169_vm3, %v339_v31, -inf }
 0x267   :  { %347 = vmax.xlane.f32.xlu1 %v346_v33 }
 0x278   :  { %365 = vrot.lane.b32.xlu1 %v2476_v15, %s2363_s1 }
 0x279   :  { %441 = vrot.lane.b32.xlu0 %v2479_v19, %s2363_s1  ;;  %s2380_s1 = smov 24  }
 0x27c   :  { %525 = vrot.lane.b32.xlu1 %v2476_v15, %s2370_s26 }
 0x280   :  { %527 = vrot.lane.b32.xlu1 %v2479_v19, %s2370_s26 }
 0x284   :  { %519 = vrot.lane.b32.xlu1 %v2479_v19, %s2371_s27 }
 0x2f0   :  { %v345_v34 = vpop.xlane.xlu0 %344 }
 0x2f1   :  { %v349_v35 = vsub.f32 %v263_v28, %v345_v34 }
 0x2f3   :  { %v351_v36 = vmul.f32 1.442695, %v349_v35 }
 0x2f4   :  { %v348_v37 = vpop.xlane.xlu1 %347  ;;  %v442_v38 = vpop.permute.xlu0 %441 }
 0x2f5   :  { %2221 = vpow2.f32 %v351_v36  ;;  %v350_v39 = vsub.f32 %v339_v31, %v348_v37  ;;  %2064 = vmatpush3.msra.mxu0 %v442_v38 }
 0x2f6   :  { %2073 = vmatprep.subr.mxu0 %v2366_v0 }
 0x2f7   :  { %v353_v40 = vmul.f32 1.442695, %v350_v39 }
 0x2f8   :  { %v366_v41 = vpop.permute.xlu1 %365 }
 0x2f9   :  { %2223 = vpow2.f32 %v353_v40  ;;  %2059 = vmatpush3.msra.mxu1 %v366_v41 }
 0x2fa   :  { %2068 = vmatprep.subr.mxu1 %v2366_v0 }
 0x2fc   :  { %v526_v48 = vpop.permute.xlu1 %525 }
 0x2fd   :  { %v531_v52 = vsel %vm169_vm3, %v526_v48, %v2482_v20 }
 0x2ff   :  { %v2222_v42 = vpop.eup %2221 }
 0x300   :  { %v355_v43 = vsel %vm169_vm3, %v2222_v42, 0.0  ;;  %v528_v50 = vpop.permute.xlu1 %527 }
 0x301   :  { %356 = vadd.xlane.f32.xlu0 %v355_v43  ;;  %v532_v57 = vsel %vm169_vm3, %v528_v50, %v2487_v23 }
 0x303   :  { %v2224_v44 = vpop.eup %2223 }
 0x304   :  { %v358_v45 = vsel %vm169_vm3, %v2224_v44, 0.0  ;;  %v520_v58 = vpop.permute.xlu1 %519 }
 0x305   :  { %359 = vadd.xlane.f32.xlu0 %v358_v45  ;;  %v524_v59 = vsel %vm169_vm3, %v520_v58, 1.0 }
 0x31b   :  { %517 = vrot.lane.b32.xlu0 %v2476_v15, %s2371_s27 }
 0x38e   :  { %v357_v46 = vpop.xlane.xlu0 %356 }
 0x38f   :  { %2225 = vrcp.f32 %v357_v46 }
 0x392   :  { %v360_v47 = vpop.xlane.xlu0 %359 }
 0x393   :  { %2227 = vrcp.f32 %v360_v47 }
 0x396   :  { %v518_v53 = vpop.permute.xlu0 %517 }
 0x397   :  { %v523_v56 = vsel %vm169_vm3, %v518_v53, 1.0 }
 0x399   :  { %v2226_v49 = vpop.eup %2225 }
 0x39a   :  { %v363_v51 = vmul.f32 %v2226_v49, %v2222_v42 }
 0x39c   :  { %2061 = vmatmul.mubr.msk.f32.vlgmr.msra.gmra.mrb[2].mxu1 %vm169_vm3, %v363_v51 }
 0x39d   :  { %v2228_v54 = vpop.eup %2227  ;;  %2069 = vmatpush3.xpose.msk.msra.mxu1 %vm190_vm2, %v531_v52  ;;  %2070 = vmatprep.mubr.msk.f32.mxu1 %vm2367_vm0, %v2366_v0 }
 0x39e   :  { %v364_v55 = vmul.f32 %v2228_v54, %v2224_v44  ;;  %2078 = vmatprep.subr.mxu1 %v2366_v0 }
 0x3a0   :  { %2066 = vmatmul.mubr.msk.f32.vlgmr.msra.gmra.mrb[6].mxu0 %vm169_vm3, %v364_v55  ;;  %2071 = vmatmul.mubr.msk.f32.vlgmr.msra.gmra.mrb[4].mxu1 %vm190_vm2, %v523_v56 }
 0x3a1   :  { %2074 = vmatpush3.xpose.msk.msra.mxu0 %vm190_vm2, %v532_v57  ;;  %2075 = vmatprep.mubr.msk.f32.mxu0 %vm2367_vm0, %v2366_v0 }
 0x3a2   :  { %2083 = vmatprep.subr.mxu0 %v2366_v0  ;;  %2080 = vmatprep.mubr.msk.f32.mxu1 %vm2367_vm0, %v2366_v0 }
 0x3a4   :  { %2076 = vmatmul.mubr.msk.f32.vlgmr.msra.gmra.mrb[8].mxu0 %vm190_vm2, %v524_v59 }
 0x3a5   :  { %2085 = vmatprep.mubr.msk.f32.mxu0 %vm2367_vm0, %v2366_v0 }
 0x46f   :  { %v2540_v60 = vpop.f32.mrb[2].mxu1 }
 0x470   :  { %v2062_v61 = vpop.f32.mrb[3].mxu1 }
 0x473   :  { %v2542_v62 = vpop.f32.mrb[6].mxu0  ;;  %v605_v63 = vpop.f32.mrb[4].mxu1 }
 0x474   :  { %v2067_v1 = vpop.f32.mrb[7].mxu0  ;;  %v2072_v2 = vpop.f32.mrb[5].mxu1  ;;  %v685_v5 = vsel %vm169_vm3, %v605_v63, -inf }
 0x475   :  { %686 = vmax.xlane.f32.xlu0 %v685_v5 }
 0x477   :  { %v681_v7 = vpop.f32.mrb[8].mxu0 }
 0x478   :  { %v2077_v8 = vpop.f32.mrb[9].mxu0  ;;  %v688_v13 = vsel %vm169_vm3, %v681_v7, -inf }
 0x479   :  { %689 = vmax.xlane.f32.xlu1 %v688_v13 }
 0x48a   :  { %707 = vrot.lane.b32.xlu1 %v2476_v15, %s2372_s28 }
 0x48b   :  { %783 = vrot.lane.b32.xlu0 %v2479_v19, %s2372_s28 }
 0x48e   :  { %867 = vrot.lane.b32.xlu1 %v2476_v15, %s2373_s29 }
 0x492   :  { %869 = vrot.lane.b32.xlu1 %v2479_v19, %s2373_s29 }
 0x496   :  { %861 = vrot.lane.b32.xlu1 %v2479_v19, %s2374_s30 }
 0x502   :  { %v687_v14 = vpop.xlane.xlu0 %686 }
 0x503   :  { %v691_v16 = vsub.f32 %v605_v63, %v687_v14 }
 0x505   :  { %v693_v17 = vmul.f32 1.442695, %v691_v16 }
 0x506   :  { %v784_v18 = vpop.permute.xlu0 %783  ;;  %v690_v21 = vpop.xlane.xlu1 %689 }
 0x507   :  { %2229 = vpow2.f32 %v693_v17  ;;  %v692_v22 = vsub.f32 %v681_v7, %v690_v21  ;;  %2084 = vmatpush3.msra.mxu0 %v784_v18 }
 0x508   :  { %2093 = vmatprep.subr.mxu0 %v2366_v0 }
 0x509   :  { %v695_v24 = vmul.f32 1.442695, %v692_v22 }
 0x50a   :  { %v708_v25 = vpop.permute.xlu1 %707 }
 0x50b   :  { %2231 = vpow2.f32 %v695_v24  ;;  %2079 = vmatpush3.msra.mxu1 %v708_v25 }
 0x50c   :  { %2088 = vmatprep.subr.mxu1 %v2366_v0 }
 0x50e   :  { %v868_v32 = vpop.permute.xlu1 %867 }
 0x50f   :  { %v873_v36 = vsel %vm169_vm3, %v868_v32, %v2482_v20 }
 0x511   :  { %v2230_v26 = vpop.eup %2229 }
 0x512   :  { %v697_v27 = vsel %vm169_vm3, %v2230_v26, 0.0  ;;  %v870_v34 = vpop.permute.xlu1 %869 }
 0x513   :  { %698 = vadd.xlane.f32.xlu0 %v697_v27  ;;  %v874_v41 = vsel %vm169_vm3, %v870_v34, %v2487_v23 }
 0x515   :  { %v2232_v28 = vpop.eup %2231 }
 0x516   :  { %v700_v29 = vsel %vm169_vm3, %v2232_v28, 0.0  ;;  %v862_v42 = vpop.permute.xlu1 %861 }
 0x517   :  { %701 = vadd.xlane.f32.xlu0 %v700_v29  ;;  %v866_v43 = vsel %vm169_vm3, %v862_v42, 1.0 }
 0x52d   :  { %859 = vrot.lane.b32.xlu0 %v2476_v15, %s2374_s30 }
 0x5a0   :  { %v699_v30 = vpop.xlane.xlu0 %698 }
 0x5a1   :  { %2233 = vrcp.f32 %v699_v30 }
 0x5a4   :  { %v702_v31 = vpop.xlane.xlu0 %701 }
 0x5a5   :  { %2235 = vrcp.f32 %v702_v31 }
 0x5a8   :  { %v860_v37 = vpop.permute.xlu0 %859 }
 0x5a9   :  { %v865_v40 = vsel %vm169_vm3, %v860_v37, 1.0 }
 0x5ab   :  { %v2234_v33 = vpop.eup %2233 }
 0x5ac   :  { %v705_v35 = vmul.f32 %v2234_v33, %v2230_v26 }
 0x5ae   :  { %2081 = vmatmul.mubr.msk.f32.vlgmr.msra.gmra.mrb[6].mxu1 %vm169_vm3, %v705_v35 }
 0x5af   :  { %v2236_v38 = vpop.eup %2235  ;;  %2089 = vmatpush3.xpose.msk.msra.mxu1 %vm190_vm2, %v873_v36  ;;  %2090 = vmatprep.mubr.msk.f32.mxu1 %vm2367_vm0, %v2366_v0 }
 0x5b0   :  { %v706_v39 = vmul.f32 %v2236_v38, %v2232_v28  ;;  %2098 = vmatprep.subr.mxu1 %v2366_v0 }
 0x5b2   :  { %2086 = vmatmul.mubr.msk.f32.vlgmr.msra.gmra.mrb[10].mxu0 %vm169_vm3, %v706_v39  ;;  %2091 = vmatmul.mubr.msk.f32.vlgmr.msra.gmra.mrb[8].mxu1 %vm190_vm2, %v865_v40 }
 0x5b3   :  { %2094 = vmatpush3.xpose.msk.msra.mxu0 %vm190_vm2, %v874_v41  ;;  %2095 = vmatprep.mubr.msk.f32.mxu0 %vm2367_vm0, %v2366_v0 }
 0x5b4   :  { %2103 = vmatprep.subr.mxu0 %v2366_v0  ;;  %2100 = vmatprep.mubr.msk.f32.mxu1 %vm2367_vm0, %v2366_v0 }
 0x5b6   :  { %2096 = vmatmul.mubr.msk.f32.vlgmr.msra.gmra.mrb[12].mxu0 %vm190_vm2, %v866_v43 }
 0x5b7   :  { %2105 = vmatprep.mubr.msk.f32.mxu0 %vm2367_vm0, %v2366_v0 }
 0x681   :  { %v2578_v44 = vpop.f32.mrb[6].mxu1 }
 0x682   :  { %v2082_v45 = vpop.f32.mrb[7].mxu1 }
 0x685   :  { %v2580_v46 = vpop.f32.mrb[10].mxu0  ;;  %v947_v47 = vpop.f32.mrb[8].mxu1 }
 0x686   :  { %v2188_v48 = vpack.i.bf16 %v2580_v46, %v2578_v44  ;;  %v2087_v49 = vpop.f32.mrb[11].mxu0  ;;  %v2092_v50 = vpop.f32.mrb[9].mxu1  ;;  %v1027_v51 = vsel %vm169_vm3, %v947_v47, -inf }
 0x687   :  { %1028 = vmax.xlane.f32.xlu0 %v1027_v51 }
 0x689   :  { %v1023_v52 = vpop.f32.mrb[12].mxu0 }
 0x68a   :  { %v2097_v53 = vpop.f32.mrb[13].mxu0  ;;  %v1030_v54 = vsel %vm169_vm3, %v1023_v52, -inf }
 0x68b   :  { %1031 = vmax.xlane.f32.xlu1 %v1030_v54 }
 0x69c   :  { %1049 = vrot.lane.b32.xlu1 %v2476_v15, %s2375_s4 }
 0x69d   :  { %1125 = vrot.lane.b32.xlu0 %v2479_v19, %s2375_s4 }
 0x6a0   :  { %1209 = vrot.lane.b32.xlu1 %v2476_v15, %s2376_s5 }
 0x6a4   :  { %1211 = vrot.lane.b32.xlu1 %v2479_v19, %s2376_s5 }
 0x6a8   :  { %1203 = vrot.lane.b32.xlu1 %v2479_v19, %s2377_s6 }
 0x714   :  { %v1029_v55 = vpop.xlane.xlu0 %1028 }
 0x715   :  { %v1033_v56 = vsub.f32 %v947_v47, %v1029_v55 }
 0x717   :  { %v1035_v57 = vmul.f32 1.442695, %v1033_v56 }
 0x718   :  { %v1126_v58 = vpop.permute.xlu0 %1125  ;;  %v1032_v59 = vpop.xlane.xlu1 %1031 }
 0x719   :  { %2237 = vpow2.f32 %v1035_v57  ;;  %v1034_v61 = vsub.f32 %v1023_v52, %v1032_v59  ;;  %2104 = vmatpush3.msra.mxu0 %v1126_v58  ;;  %v2209_v57 = vld [vmem:[#allocation7 + $0x18] sm:$0xff]  }
 0x71a   :  { %2113 = vmatprep.subr.mxu0 %v2366_v0 }
 0x71b   :  { %v1037_v63 = vmul.f32 1.442695, %v1034_v61 }
 0x71c   :  { %v1050_v1 = vpop.permute.xlu1 %1049 }
 0x71d   :  { %2239 = vpow2.f32 %v1037_v63  ;;  %2099 = vmatpush3.msra.mxu1 %v1050_v1 }
 0x71e   :  { %2108 = vmatprep.subr.mxu1 %v2366_v0 }
 0x720   :  { %v1210_v16 = vpop.permute.xlu1 %1209 }
 0x721   :  { %v1215_v22 = vsel %vm169_vm3, %v1210_v16, %v2482_v20 }
 0x723   :  { %v2238_v2 = vpop.eup %2237 }
 0x724   :  { %v1039_v5 = vsel %vm169_vm3, %v2238_v2, 0.0  ;;  %v1212_v18 = vpop.permute.xlu1 %1211 }
 0x725   :  { %1040 = vadd.xlane.f32.xlu0 %v1039_v5  ;;  %v1216_v28 = vsel %vm169_vm3, %v1212_v18, %v2487_v23 }
 0x727   :  { %v2240_v7 = vpop.eup %2239 }
 0x728   :  { %v1042_v8 = vsel %vm169_vm3, %v2240_v7, 0.0  ;;  %v1204_v29 = vpop.permute.xlu1 %1203 }
 0x729   :  { %1043 = vadd.xlane.f32.xlu0 %v1042_v8  ;;  %v1208_v20 = vsel %vm169_vm3, %v1204_v29, 1.0  ;;  %v1578_v29 = vsub.s32 1, %v2466_v9 }
 0x73f   :  { %1201 = vrot.lane.b32.xlu0 %v2476_v15, %s2377_s6 }
 0x7b2   :  { %v1041_v13 = vpop.xlane.xlu0 %1040 }
 0x7b3   :  { %2241 = vrcp.f32 %v1041_v13 }
 0x7b6   :  { %v1044_v14 = vpop.xlane.xlu0 %1043 }
 0x7b7   :  { %2243 = vrcp.f32 %v1044_v14 }
 0x7ba   :  { %v1202_v24 = vpop.permute.xlu0 %1201 }
 0x7bb   :  { %v1207_v27 = vsel %vm169_vm3, %v1202_v24, 1.0 }
 0x7bd   :  { %v2242_v17 = vpop.eup %2241 }
 0x7be   :  { %v1047_v21 = vmul.f32 %v2242_v17, %v2238_v2 }
 0x7c0   :  { %2101 = vmatmul.mubr.msk.f32.vlgmr.msra.gmra.mrb[10].mxu1 %vm169_vm3, %v1047_v21 }
 0x7c1   :  { %v2244_v25 = vpop.eup %2243  ;;  %2109 = vmatpush3.xpose.msk.msra.mxu1 %vm190_vm2, %v1215_v22  ;;  %2110 = vmatprep.mubr.msk.f32.mxu1 %vm2367_vm0, %v2366_v0 }
 0x7c2   :  { %v1048_v26 = vmul.f32 %v2244_v25, %v2240_v7  ;;  %2118 = vmatprep.subr.mxu1 %v2366_v0 }
 0x7c4   :  { %2106 = vmatmul.mubr.msk.f32.vlgmr.msra.gmra.mrb[14].mxu0 %vm169_vm3, %v1048_v26  ;;  %2111 = vmatmul.mubr.msk.f32.vlgmr.msra.gmra.mrb[12].mxu1 %vm190_vm2, %v1207_v27 }
 0x7c5   :  { %2114 = vmatpush3.xpose.msk.msra.mxu0 %vm190_vm2, %v1216_v28  ;;  %2115 = vmatprep.mubr.msk.f32.mxu0 %vm2367_vm0, %v2366_v0 }
 0x7c6   :  { %2123 = vmatprep.subr.mxu0 %v2366_v0  ;;  %2120 = vmatprep.mubr.msk.f32.mxu1 %vm2367_vm0, %v2366_v0 }
 0x7c8   :  { %2116 = vmatmul.mubr.msk.f32.vlgmr.msra.gmra.mrb[16].mxu0 %vm190_vm2, %v1208_v20 }
 0x7c9   :  { %2125 = vmatprep.mubr.msk.f32.mxu0 %vm2367_vm0, %v2366_v0 }
 0x893   :  { %v1121_v23 = vpop.f32.mrb[10].mxu1 }
 0x894   :  { %v2102_v30 = vpop.f32.mrb[11].mxu1 }
 0x897   :  { %v1197_v31 = vpop.f32.mrb[14].mxu0  ;;  %v1289_v32 = vpop.f32.mrb[12].mxu1 }
 0x898   :  { %v2193_v33 = vpack.i.bf16 %v1197_v31, %v1121_v23  ;;  %v2107_v34 = vpop.f32.mrb[15].mxu0  ;;  %v2112_v35 = vpop.f32.mrb[13].mxu1  ;;  %v1369_v36 = vsel %vm169_vm3, %v1289_v32, -inf  ;;  %v60_v31 = vunpack.c.h.bf16 %v2452_v3 }
 0x899   :  { %1370 = vmax.xlane.f32.xlu0 %v1369_v36 }
 0x89b   :  { %v1365_v37 = vpop.f32.mrb[16].mxu0 }
 0x89c   :  { %v2117_v38 = vpop.f32.mrb[17].mxu0  ;;  %v1372_v39 = vsel %vm169_vm3, %v1365_v37, -inf }
 0x89d   :  { %1373 = vmax.xlane.f32.xlu1 %v1372_v39 }
 0x8ae   :  { %1391 = vrot.lane.b32.xlu1 %v2476_v15, %s2378_s7 }
 0x8b2   :  { %2189 = vrot.lane.b32.xlu1 %v2188_v48, %s2361_s23 }
 0x8b6   :  { %2194 = vrot.lane.b32.xlu1 %v2193_v33, %s2379_s8 }
 0x926   :  { %v1371_v40 = vpop.xlane.xlu0 %1370 }
 0x927   :  { %v1375_v41 = vsub.f32 %v1289_v32, %v1371_v40 }
 0x929   :  { %v1377_v42 = vmul.f32 1.442695, %v1375_v41 }
 0x92a   :  { %v1374_v43 = vpop.xlane.xlu1 %1373 }
 0x92b   :  { %2245 = vpow2.f32 %v1377_v42  ;;  %v1376_v45 = vsub.f32 %v1365_v37, %v1374_v43 }
 0x92d   :  { %v1379_v47 = vmul.f32 1.442695, %v1376_v45 }
 0x92e   :  { %v1392_v49 = vpop.permute.xlu1 %1391 }
 0x92f   :  { %2247 = vpow2.f32 %v1379_v47  ;;  %2119 = vmatpush3.msra.mxu1 %v1392_v49 }
 0x930   :  { %2144 = vmatprep.subr.bf16.mxu1 %v2366_v0 }
 0x932   :  { %v2190_v2 = vpop.permute.xlu1 %2189 }
 0x933   :  { %v2192_v7 = vunpack.i.h.bf16 %v2190_v2  ;;  %v2191_v8 = vunpack.i.l.bf16 %v2190_v2 }
 0x935   :  { %v2246_v15 = vpop.eup %2245  ;;  %v1568_v17 = vsel %vm169_vm3, %v2542_v62, %v2192_v7  ;;  %v1567_v18 = vsel %vm169_vm3, %v2540_v60, %v2191_v8  ;;  %v1579_v62 = vrot.slane %v94_v11, %v1578_v29  ;;  %v59_v60 = vunpack.c.l.bf16 %v2452_v3 }
 0x936   :  { %v1381_v50 = vsel %vm169_vm3, %v2246_v15, 0.0  ;;  %v2195_v5 = vpop.permute.xlu1 %2194 }
 0x937   :  { %1382 = vadd.xlane.f32.xlu0 %v1381_v50  ;;  %v2197_v13 = vunpack.i.h.bf16 %v2195_v5  ;;  %v2196_v14 = vunpack.i.l.bf16 %v2195_v5 }
 0x939   :  { %v2248_v44 = vpop.eup %2247  ;;  %v1570_v24 = vsel %vm1569_vm4, %v1567_v18, %v2196_v14  ;;  %v1571_v25 = vsel %vm1569_vm4, %v1568_v17, %v2197_v13  ;;  %v2381_v14 = vmov 0  }
 0x93a   :  { %v1384_v46 = vsel %vm169_vm3, %v2248_v44, 0.0  ;;  %2203 = vset.pattern.permute.xlu0 %v2381_v14  ;;  %2204 = vset.pattern.permute.xlu1 %v2381_v14 }
 0x93b   :  { %1385 = vadd.xlane.f32.xlu0 %v1384_v46 }
 0x951   :  { %1467 = vrot.lane.b32.xlu0 %v2479_v19, %s2378_s7  ;;  %v2208_v19 = vld [vmem:[#allocation7 + $0x10] sm:$0xff]  }
 0x9c4   :  { %v1383_v48 = vpop.xlane.xlu0 %1382 }
 0x9c5   :  { %2249 = vrcp.f32 %v1383_v48 }
 0x9c8   :  { %v1386_v51 = vpop.xlane.xlu0 %1385 }
 0x9c9   :  { %2251 = vrcp.f32 %v1386_v51  ;;  %v97_v51 = vld [vmem:[#allocation7 + $0x70] sm:$0x2] }
 0x9cc   :  { %v1468_v52 = vpop.permute.xlu0 %1467 }
 0x9cd   :  { %2124 = vmatpush3.msra.mxu0 %v1468_v52  ;;  %v98_v52 = vunpack.c.l.bf16 %v97_v51 }
 0x9ce   :  { %2128 = vmatprep.subr.bf16.mxu0 %v2366_v0 }
 0x9cf   :  { %v2250_v53 = vpop.eup %2249 }
 0x9d0   :  { %v1389_v54 = vmul.f32 %v2250_v53, %v2246_v15  ;;  %v1667_v53 = vsub.s32 2, %v2466_v9 }
 0x9d2   :  { %2121 = vmatmul.mubr.msk.f32.vlgmr.msra.gmra.mrb[14].mxu1 %vm169_vm3, %v1389_v54  ;;  %v1673_v54 = vsub.s32 3, %v2466_v9 }
 0x9d3   :  { %v2252_v55 = vpop.eup %2251  ;;  %2160 = vmatprep.mubr.msk.bf16.mxu1 %vm2367_vm0, %v2366_v0 }
 0x9d4   :  { %v1390_v56 = vmul.f32 %v2252_v55, %v2248_v44  ;;  %v1668_v55 = vrot.slane %v98_v52, %v1667_v53  ;;  %v2218_v53 = vld [vmem:[#allocation7 + $0x60] sm:$0xff]  }
 0x9d6   :  { %2126 = vmatmul.mubr.msk.f32.vlgmr.msra.gmra.mrb[18].mxu0 %vm169_vm3, %v1390_v56 }
 0x9d7   :  { %2132 = vmatprep.mubr.msk.bf16.mxu0 %vm2367_vm0, %v2366_v0  ;;  %2129 = vmatpush3.bf16.msra.mxu0 %v2208_v19 }
 0x9d8   :  { %2130 = vmatprep.subr.bf16.mxu0 %v2366_v0 }
 0x9db   :  { %2131 = vmatpush3.bf16.msra.mxu0 %v2209_v57  ;;  %v1674_v57 = vrot.slane %v98_v52, %v1673_v54  ;;  %v2219_v54 = vld [vmem:[#allocation7 + $0x68] sm:$0xff]  }
 0x9dc   :  { %2136 = vmatprep.subr.bf16.mxu0 %v2366_v0 }
 0xaa5   :  { %v1463_v58 = vpop.f32.mrb[14].mxu1 }
 0xaa6   :  { %v2122_v59 = vpop.f32.mrb[15].mxu1 }
 0xaa9   :  { %v1539_v61 = vpop.f32.mrb[18].mxu0 }
 0xaaa   :  { %v2198_v63 = vpack.i.bf16 %v1539_v61, %v1463_v58  ;;  %v2127_v1 = vpop.f32.mrb[19].mxu0 }
 0xaac   :  { %2199 = vrot.lane.b32.xlu0 %v2198_v63, %s2380_s1 }
 0xb1e   :  { %v2200_v16 = vpop.permute.xlu0 %2199 }
 0xb1f   :  { %v2202_v21 = vunpack.i.h.bf16 %v2200_v16  ;;  %v2201_v22 = vunpack.i.l.bf16 %v2200_v16 }
 0xb21   :  { %v1574_v26 = vsel %vm1572_vm5, %v1571_v25, %v2202_v21  ;;  %v1573_v27 = vsel %vm1572_vm5, %v1570_v24, %v2201_v22 }
 0xb22   :  { %v1575_v28 = vpack.c.bf16 %v1574_v26, %v1573_v27 }
 0xb24   :  { %2133 = vmatmul.mubr.msk.bf16.vlgmr.msra.gmra.mrb[20].mxu0 %vm124_vm1, %v1575_v28 }
 0xb25   :  { %2140 = vmatprep.mubr.msk.bf16.mxu0 %vm2367_vm0, %v2366_v0 }
 0xbf7   :  { %v1629_v20 = vpop.f32.mrb[20].mxu0 }
 0xbf8   :  { %v1630_v23 = vadd.f32 %v1629_v20, %v1579_v62  ;;  %v2134_v30 = vpop.f32.mrb[21].mxu0  ;;  %v2212_v20 = vld [vmem:[#allocation7 + $0x30] sm:$0xff]  }
 0xbf9   :  { %v1632_v32 = vpop.f32.mrb[22].mxu0  ;;  %2145 = vmatpush3.bf16.msra.mxu1 %v2212_v20  ;;  %v2214_v30 = vld [vmem:[#allocation7 + $0x40] sm:$0xff]  }
 0xbfa   :  { %v1633_v33 = vadd.f32 %v1632_v32, %v1579_v62  ;;  %v2135_v34 = vpop.f32.mrb[23].mxu0  ;;  %v1636_v35 = vadd.f32 %v1630_v23, %v59_v60  ;;  %v2210_v62 = vld [vmem:[#allocation7 + $0x20] sm:$0xff]   ;;  %v2213_v23 = vld [vmem:[#allocation7 + $0x38] sm:$0xff]   ;;  %2146 = vmatprep.subr.bf16.mxu1 %v2366_v0 }
 0xbfb   :  { %2137 = vmatpush3.bf16.msra.mxu0 %v2210_v62 }
 0xbfc   :  { %v1638_v36 = vsel %vm124_vm1, %v1636_v35, 0.0  ;;  %v1637_v37 = vadd.f32 %v1633_v33, %v60_v31  ;;  %2138 = vmatprep.subr.bf16.mxu0 %v2366_v0 }
 0xbfd   :  { %1639 = vadd.xlane.f32.xlu1 %v1638_v36  ;;  %2147 = vmatpush3.bf16.msra.mxu1 %v2213_v23 }
 0xbfe   :  { %v1641_v38 = vsel %vm124_vm1, %v1637_v37, 0.0  ;;  %2148 = vmatprep.subr.bf16.mxu1 %v2366_v0 }
 0xbff   :  { %1642 = vadd.xlane.f32.xlu0 %v1641_v38  ;;  %v99_v38 = vld [vmem:[#allocation7 + $0x70] sm:$0x4] }
 0xc01   :  { %2149 = vmatpush3.bf16.msra.mxu1 %v2214_v30 }
 0xc02   :  { %2150 = vmatprep.subr.bf16.mxu1 %v2366_v0 }
 0xc8a   :  { %v1640_v10 = vpop.xlane.xlu1 %1639 }
 0xc8b   :  { %v1645_v11 = vmul.f32 0.03125, %v1640_v10  ;;  %v100_v10 = vunpack.c.l.bf16 %v99_v38  ;;  %v101_v38 = vld [vmem:[#allocation7 + $0x74] sm:$0x1] }
 0xc8c   :  { %v1643_v39 = vpop.xlane.xlu0 %1642 }
 0xc8d   :  { %v1647_v40 = vsub.f32 %v1636_v35, %v1645_v11  ;;  %v1646_v41 = vmul.f32 0.03125, %v1643_v39  ;;  %v1707_v11 = vsub.s32 4, %v2466_v9  ;;  %v1713_v39 = vsub.s32 5, %v2466_v9 }
 0xc8f   :  { %v1648_v42 = vsub.f32 %v1637_v37, %v1646_v41  ;;  %v1649_v43 = vmul.f32 %v1647_v40, %v1647_v40 }
 0xc91   :  { %v1651_v3 = vsel %vm124_vm1, %v1649_v43, 0.0  ;;  %v1650_v45 = vmul.f32 %v1648_v42, %v1648_v42  ;;  %v1714_v43 = vrot.slane %v100_v10, %v1713_v39 }
 0xc92   :  { %1652 = vadd.xlane.f32.xlu0 %v1651_v3 }
 0xc93   :  { %v1654_v47 = vsel %vm124_vm1, %v1650_v45, 0.0 }
 0xc94   :  { %1655 = vadd.xlane.f32.xlu1 %v1654_v47 }
 0xd1f   :  { %v1653_v49 = vpop.xlane.xlu0 %1652 }
 0xd20   :  { %v1657_v15 = vmul.f32 0.03125, %v1653_v49 }
 0xd21   :  { %v1656_v50 = vpop.xlane.xlu1 %1655 }
 0xd22   :  { %v1659_v44 = vadd.f32 1e-05, %v1657_v15  ;;  %v1658_v46 = vmul.f32 0.03125, %v1656_v50 }
 0xd24   :  { %2253 = vrsqrt.f32 %v1659_v44  ;;  %v1660_v48 = vadd.f32 1e-05, %v1658_v46 }
 0xd26   :  { %2255 = vrsqrt.f32 %v1660_v48 }
 0xd2e   :  { %v2254_v56 = vpop.eup %2253 }
 0xd2f   :  { %v1663_v19 = vmul.f32 %v2254_v56, %v1647_v40  ;;  %v1708_v40 = vrot.slane %v100_v10, %v1707_v11  ;;  %v102_v11 = vunpack.c.l.bf16 %v101_v38 }
 0xd30   :  { %v2256_v58 = vpop.eup %2255 }
 0xd31   :  { %v1669_v59 = vmul.f32 %v1668_v55, %v1663_v19  ;;  %v1664_v61 = vmul.f32 %v2256_v58, %v1648_v42  ;;  %v1732_v19 = vsub.s32 6, %v2466_v9  ;;  %v1917_v39 = vrot.slane %v102_v11, %v105_v12 }
 0xd33   :  { %v1675_v63 = vadd.f32 %v1674_v57, %v1669_v59  ;;  %v1670_v1 = vmul.f32 %v1668_v55, %v1664_v61  ;;  %v95_v55 = vld [vmem:[#allocation7 + $0x70] sm:$0x8] }
 0xd34   :  { %v96_v56 = vunpack.c.l.bf16 %v95_v55 }
 0xd35   :  { %v1677_v2 = vadd.f32 %v1675_v63, %v59_v60  ;;  %v1676_v5 = vadd.f32 %v1674_v57, %v1670_v1  ;;  %v2211_v60 = vld [vmem:[#allocation7 + $0x28] sm:$0xff]  }
 0xd36   :  { %2139 = vmatpush3.bf16.msra.mxu0 %v2211_v60  ;;  %v1733_v57 = vrot.slane %v96_v56, %v1732_v19 }
 0xd37   :  { %v1679_v7 = vsel %vm124_vm1, %v1677_v2, 0.0  ;;  %v1678_v8 = vadd.f32 %v1676_v5, %v60_v31  ;;  %v2215_v31 = vld [vmem:[#allocation7 + $0x48] sm:$0xff]  }
 0xd38   :  { %1680 = vadd.xlane.f32.xlu0 %v1679_v7  ;;  %2151 = vmatpush3.bf16.msra.mxu1 %v2215_v31 }
 0xd39   :  { %v1682_v13 = vsel %vm124_vm1, %v1678_v8, 0.0  ;;  %2152 = vmatprep.subr.bf16.mxu1 %v2366_v0 }
 0xd3a   :  { %1683 = vadd.xlane.f32.xlu1 %v1682_v13  ;;  %v1795_v13 = vsub.s32 7, %v2466_v9 }
 0xdc5   :  { %v1681_v16 = vpop.xlane.xlu0 %1680 }
 0xdc6   :  { %v1685_v17 = vmul.f32 0.03125, %v1681_v16 }
 0xdc7   :  { %v1684_v18 = vpop.xlane.xlu1 %1683 }
 0xdc8   :  { %v1687_v21 = vsub.f32 %v1677_v2, %v1685_v17  ;;  %v1686_v22 = vmul.f32 0.03125, %v1684_v18 }
 0xdca   :  { %v1688_v24 = vsub.f32 %v1678_v8, %v1686_v22  ;;  %v1689_v25 = vmul.f32 %v1687_v21, %v1687_v21 }
 0xdcc   :  { %v1691_v26 = vsel %vm124_vm1, %v1689_v25, 0.0  ;;  %v1690_v27 = vmul.f32 %v1688_v24, %v1688_v24 }
 0xdcd   :  { %1692 = vadd.xlane.f32.xlu0 %v1691_v26 }
 0xdce   :  { %v1694_v28 = vsel %vm124_vm1, %v1690_v27, 0.0 }
 0xdcf   :  { %1695 = vadd.xlane.f32.xlu1 %v1694_v28 }
 0xde0   :  { %1724 = vperm.xlu1 %2204, %v2463_v6   ;;  %v2217_v6 = vld [vmem:[#allocation7 + $0x58] sm:$0xff]  }
 0xde3   :  { %1719 = vperm.xlu0 %2203, %v2460_v4   ;;  %v2216_v4 = vld [vmem:[#allocation7 + $0x50] sm:$0xff]  }
 0xde4   :  { %2153 = vmatpush3.bf16.msra.mxu1 %v2216_v4 }
 0xde5   :  { %2154 = vmatprep.subr.bf16.mxu1 %v2366_v0 }
 0xde8   :  { %2155 = vmatpush3.bf16.msra.mxu1 %v2217_v6 }
 0xde9   :  { %2156 = vmatprep.subr.bf16.mxu1 %v2366_v0 }
 0xdec   :  { %2157 = vmatpush3.bf16.msra.mxu1 %v2218_v53 }
 0xded   :  { %2158 = vmatprep.subr.bf16.mxu1 %v2366_v0  ;;  %v1796_v0 = vrot.slane %v96_v56, %v1795_v13 }
 0xdf0   :  { %2159 = vmatpush3.bf16.msra.mxu1 %v2219_v54 }
 0xe5a   :  { %v1693_v32 = vpop.xlane.xlu0 %1692 }
 0xe5b   :  { %v1697_v33 = vmul.f32 0.03125, %v1693_v32 }
 0xe5c   :  { %v1696_v34 = vpop.xlane.xlu1 %1695 }
 0xe5d   :  { %v1699_v35 = vadd.f32 1e-05, %v1697_v33  ;;  %v1698_v36 = vmul.f32 0.03125, %v1696_v34 }
 0xe5f   :  { %2257 = vrsqrt.f32 %v1699_v35  ;;  %v1700_v37 = vadd.f32 1e-05, %v1698_v36 }
 0xe60   :  { %v2675_v44 = vpop.permute.xlu1 %1724 }
 0xe61   :  { %2259 = vrsqrt.f32 %v1700_v37 }
 0xe62   :  { %v2673_v50 = vpop.permute.xlu0 %1719 }
 0xe69   :  { %v2258_v41 = vpop.eup %2257 }
 0xe6a   :  { %v1703_v42 = vmul.f32 %v2258_v41, %v1687_v21  ;;  %v1923_v41 = vrot.slane %v102_v11, %v1578_v29 }
 0xe6b   :  { %v2260_v3 = vpop.eup %2259 }
 0xe6c   :  { %v1709_v45 = vmul.f32 %v1708_v40, %v1703_v42  ;;  %v1704_v47 = vmul.f32 %v2260_v3, %v1688_v24 }
 0xe6e   :  { %v1715_v49 = vadd.f32 %v1714_v43, %v1709_v45  ;;  %v1710_v15 = vmul.f32 %v1708_v40, %v1704_v47 }
 0xe70   :  { %v1716_v46 = vadd.f32 %v1714_v43, %v1710_v15  ;;  %v1727_v48 = vmul.f32 %v2673_v50, %v1715_v49 }
 0xe72   :  { %v1728_v51 = vmul.f32 %v2675_v44, %v1716_v46 }
 0xe74   :  { %v1729_v52 = vpack.c.bf16 %v1728_v51, %v1727_v48 }
 0xe76   :  { %2141 = vmatmul.mubr.msk.bf16.vlgmr.msra.gmra.mrb[24].mxu0 %vm124_vm1, %v1729_v52 }
 0xf49   :  { %v1783_v58 = vpop.f32.mrb[24].mxu0 }
 0xf4a   :  { %v1784_v59 = vadd.f32 %v1783_v58, %v1733_v57  ;;  %v2142_v61 = vpop.f32.mrb[25].mxu0 }
 0xf4b   :  { %v1786_v63 = vpop.f32.mrb[26].mxu0 }
 0xf4c   :  { %v1787_v1 = vadd.f32 %v1786_v63, %v1733_v57  ;;  %v2143_v2 = vpop.f32.mrb[27].mxu0  ;;  %v1790_v5 = vmax.f32 %v1784_v59, 0.0 }
 0xf4e   :  { %v1791_v7 = vmax.f32 %v1787_v1, 0.0 }
 0xf50   :  { %v1792_v8 = vpack.c.bf16 %v1791_v7, %v1790_v5 }
 0xf52   :  { %2161 = vmatmul.mubr.bf16.vlgmr.msra.gmra.mrb[16].mxu1 %v1792_v8 }
0x1025   :  { %v1879_v14 = vpop.f32.mrb[16].mxu1 }
0x1026   :  { %v1880_v16 = vadd.f32 %v1879_v14, %v1796_v0  ;;  %v2162_v17 = vpop.f32.mrb[17].mxu1 }
0x1027   :  { %v1882_v18 = vpop.f32.mrb[18].mxu1 }
0x1028   :  { %v1883_v21 = vadd.f32 %v1882_v18, %v1796_v0  ;;  %v2163_v22 = vpop.f32.mrb[19].mxu1  ;;  %v1886_v24 = vadd.f32 %v1880_v16, %v1727_v48 }
0x102a   :  { %v1888_v25 = vsel %vm124_vm1, %v1886_v24, 0.0  ;;  %v1887_v26 = vadd.f32 %v1883_v21, %v1728_v51 }
0x102b   :  { %1889 = vadd.xlane.f32.xlu1 %v1888_v25 }
0x102c   :  { %v1891_v27 = vsel %vm124_vm1, %v1887_v26, 0.0 }
0x102d   :  { %1892 = vadd.xlane.f32.xlu0 %v1891_v27 }
0x10b8   :  { %v1890_v28 = vpop.xlane.xlu1 %1889 }
0x10b9   :  { %v1894_v62 = vmul.f32 0.03125, %v1890_v28 }
0x10ba   :  { %v1893_v60 = vpop.xlane.xlu0 %1892 }
0x10bb   :  { %v1896_v20 = vsub.f32 %v1886_v24, %v1894_v62  ;;  %v1895_v23 = vmul.f32 0.03125, %v1893_v60 }
0x10bd   :  { %v1897_v30 = vsub.f32 %v1887_v26, %v1895_v23  ;;  %v1898_v31 = vmul.f32 %v1896_v20, %v1896_v20 }
0x10bf   :  { %v1900_v4 = vsel %vm124_vm1, %v1898_v31, 0.0  ;;  %v1899_v6 = vmul.f32 %v1897_v30, %v1897_v30 }
0x10c0   :  { %1901 = vadd.xlane.f32.xlu1 %v1900_v4 }
0x10c1   :  { %v1903_v32 = vsel %vm124_vm1, %v1899_v6, 0.0 }
0x10c4   :  { %1904 = vadd.xlane.f32.xlu1 %v1903_v32 }
0x114d   :  { %v1902_v33 = vpop.xlane.xlu1 %1901 }
0x114e   :  { %v1906_v34 = vmul.f32 0.03125, %v1902_v33 }
0x1150   :  { %v1908_v35 = vadd.f32 1e-05, %v1906_v34 }
0x1151   :  { %v1905_v36 = vpop.xlane.xlu1 %1904 }
0x1152   :  { %2261 = vrsqrt.f32 %v1908_v35  ;;  %v1907_v37 = vmul.f32 0.03125, %v1905_v36 }
0x1154   :  { %v1909_v10 = vadd.f32 1e-05, %v1907_v37 }
0x1156   :  { %2263 = vrsqrt.f32 %v1909_v10 }
0x115c   :  { %v2262_v40 = vpop.eup %2261 }
0x115d   :  { %v1912_v42 = vmul.f32 %v2262_v40, %v1896_v20 }
0x115f   :  { %v1918_v43 = vmul.f32 %v1917_v39, %v1912_v42 }
0x1160   :  { %v2264_v3 = vpop.eup %2263 }
0x1161   :  { %v1913_v45 = vmul.f32 %v2264_v3, %v1897_v30  ;;  %v1924_v47 = vadd.f32 %v1923_v41, %v1918_v43 }
0x1163   :  { %v1919_v49 = vmul.f32 %v1917_v39, %v1913_v45  ;;  %v1926_v15 = vmul.f32 %v1924_v47, %v2673_v50 }
0x1165   :  { %v1925_v46 = vadd.f32 %v1923_v41, %v1919_v49  ;;  %1928 = vst.msk [vmem:[#allocation8] sm:$0xff] %vm124_vm1, %v1926_v15 }
0x1167   :  { %v1927_v48 = vmul.f32 %v1925_v46, %v2675_v44 }
0x1169   :  { %1929 = vst.msk [vmem:[#allocation8 + $0x8] sm:$0xff] %vm124_vm1, %v1927_v48 }
0x116a   :  { %2342 = shalt.err (!%p2339_p0)
}
0x116b   :  { %s2343_s14 = scalar_lea.hbm %s2713_s3, 256 }
0x116c   :  { %p2344_p1 = scmp.ne.s32.totalorder %s2713_s3, %s2343_s14  ;;  %p2347_p2 = scmp.lt.u32.totalorder %s2343_s14, %s2713_s3 }
0x116e   :  { %p2349_p3 = pnand %p2347_p2, %p2344_p1 }
0x1170   :  { %2352 = shalt.err (!%p2349_p3)
}
0x1171   :  { %1941 = dma.vmem_to_hbm [thread:$0]  %s1936_s10, 256, %s2713_s3, [#allocation4], %s2360_s22, %s2360_s22, %s2361_s23  }
0x1172   :  { %2357 = dma.done.wait [#allocation4], 256  }
0x1173   :  { %2358 = vsyncadd [#allocation4], 4294967040 }
0x1174   :  { %1945 = vsyncpa [#allocation3], 1 }
0x1175   :  { %1946 = vsyncpa [#allocation6], 1 }
0x1176   :  { %1947 = vsyncpa [#allocation4], 1 }

</bundles_post_ra>
